<compile_context>
chip_gen: v5e
topology: v5e:2x2
jax: 0.10.0
libtpu: 0.0.40
codegen_flags: <defaults>
</compile_context>

<pallas_src>
import math

import jax
import jax.numpy as jnp
from jax.experimental import pallas as pl
from jax.experimental.pallas import tpu as pltpu

HIDDEN = 32          # args['hidden_units']
NUM_HEADS = 2        # args['num_heads']
HEAD_DIM = HIDDEN // NUM_HEADS
NUM_BLOCKS = 2       # args['num_blocks']
MAXLEN = 8           # args['maxlen']
ITEM_NUM = 100
LN_EPS = 1e-8
NEG_INF = -1e30


# ----------------------------- kernel helpers -----------------------------

def _ln(x, g, b):
    """LayerNorm over the last dim; g, b are (1, H) rows broadcast over rows."""
    mu = jnp.mean(x, axis=-1, keepdims=True)
    var = jnp.mean((x - mu) ** 2, axis=-1, keepdims=True)
    return (x - mu) * jax.lax.rsqrt(var + LN_EPS) * g + b


# ----------------------------- fused Pallas kernel -------------------------

def _farf_kernel(x_ref, m_ref, pos_ref, neg_ref, lnp_ref,
                 wqkv_ref, bqkv_ref, wo_ref, bo_ref, wff_ref, bff_ref,
                 out_ref):
    """FARF forward for one batch tile.

    x_ref    : (TB, S, H)   embedded + positioned + masked input rows
    m_ref    : (TB, S, 1)   timeline mask (1.0 = valid item)
    pos_ref  : (TB, S, H)   positive item embeddings
    neg_ref  : (TB, S, H)   negative item embeddings
    lnp_ref  : (4*NB+2, 1, H)      LN params: per block [g1,b1,g2,b2], then [last_g,last_b]
    wqkv_ref : (NB*3*NH, H, HD)    per-head Wq^T/Wk^T/Wv^T slices (leading-dim indexed)
    bqkv_ref : (NB*3*NH, 1, HD)    per-head q/k/v bias slices
    wo_ref   : (NB*NH, HD, H)      per-head rows of out_proj^T
    bo_ref   : (NB, 1, H)          out_proj bias
    wff_ref  : (NB*2, H, H)        conv1^T, conv2^T per block
    bff_ref  : (NB*2, 1, H)        conv1/conv2 bias per block
    out_ref  : (TB, 2, S)   row 0 = pos logits, row 1 = neg logits
    """
    TB, S, H = x_ref.shape
    N = TB * S
    HD = HEAD_DIM
    NH = NUM_HEADS

    x = x_ref[...].reshape(N, H)      # row-major activations for the big matmuls
    m = m_ref[...].reshape(N, 1)

    # Per-sequence causal additive bias (S, S), shared across the batch tile.
    ri = jax.lax.broadcasted_iota(jnp.int32, (S, S), 0)
    ci = jax.lax.broadcasted_iota(jnp.int32, (S, S), 1)
    bias = jnp.where(ri >= ci, jnp.float32(0.0), jnp.float32(NEG_INF))   # (S, S)

    scale = 1.0 / math.sqrt(HD)
    seqs = x
    for blk in range(NUM_BLOCKS):                 # static loop, weights resident
        ln1g = lnp_ref[4 * blk + 0]               # (1, H)
        ln1b = lnp_ref[4 * blk + 1]
        ln2g = lnp_ref[4 * blk + 2]
        ln2b = lnp_ref[4 * blk + 3]

        # attention layernorm (queries only, SASRec-style)
        q_in = _ln(seqs, ln1g, ln1b)              # (N, H)

        attn = jnp.zeros((N, H), jnp.float32)
        for h in range(NH):                       # static 2-iteration loop
            iq = (blk * 3 + 0) * NH + h
            ik = (blk * 3 + 1) * NH + h
            iv = (blk * 3 + 2) * NH + h
            qh = jnp.dot(q_in, wqkv_ref[iq],
                         preferred_element_type=jnp.float32) + bqkv_ref[iq]   # (N, HD)
            kh = jnp.dot(seqs, wqkv_ref[ik],
                         preferred_element_type=jnp.float32) + bqkv_ref[ik]
            vh = jnp.dot(seqs, wqkv_ref[iv],
                         preferred_element_type=jnp.float32) + bqkv_ref[iv]

            qb = (qh * scale).reshape(TB, S, HD)
            kb = kh.reshape(TB, S, HD)
            vb = vh.reshape(TB, S, HD)

            # per-batch-element attention: (TB, S, S) scores, O(S^2) per element
            s = jnp.einsum('bqd,bkd->bqk', qb, kb,
                           preferred_element_type=jnp.float32) + bias[None]
            s = s - jnp.max(s, axis=-1, keepdims=True)
            p = jnp.exp(s)
            p = p / jnp.sum(p, axis=-1, keepdims=True)   # exact reciprocal
            ob = jnp.einsum('bqk,bkd->bqd', p, vb,
                            preferred_element_type=jnp.float32)              # (TB,S,HD)

            # per-head accumulation into the out-projection (no head concat)
            attn = attn + jnp.dot(ob.reshape(N, HD), wo_ref[blk * NH + h],
                                  preferred_element_type=jnp.float32)        # (N, H)
        attn = attn + bo_ref[blk]
        seqs = q_in + attn                        # residual with layernormed queries

        # forward layernorm + PointWiseFeedForward (Conv1d k=1 == matmul)
        y = _ln(seqs, ln2g, ln2b)
        h1 = jnp.dot(y, wff_ref[blk * 2 + 0],
                     preferred_element_type=jnp.float32) + bff_ref[blk * 2 + 0]
        h1 = jnp.maximum(h1, 0.0)
        ff = jnp.dot(h1, wff_ref[blk * 2 + 1],
                     preferred_element_type=jnp.float32) + bff_ref[blk * 2 + 1]
        seqs = (ff + y) * m                       # FFN residual, then timeline mask

    # final LayerNorm + pos/neg logit head
    feats = _ln(seqs, lnp_ref[4 * NUM_BLOCKS + 0], lnp_ref[4 * NUM_BLOCKS + 1])
    feats3 = feats.reshape(TB, S, H)
    pos_l = jnp.sum(feats3 * pos_ref[...], axis=-1)        # (TB, S)
    neg_l = jnp.sum(feats3 * neg_ref[...], axis=-1)        # (TB, S)
    out_ref[...] = jnp.concatenate([pos_l[:, None, :], neg_l[:, None, :]], axis=1)


# ----------------------------- weight packing ------------------------------

def _pack_weights(params):
    """Repack torch-shaped params for leading-dim-only indexing in the kernel."""
    H, HD, NH = HIDDEN, HEAD_DIM, NUM_HEADS
    lnp_rows, wqkv, bqkv, wo, bo, wff, bff = [], [], [], [], [], [], []
    for bp in params['blocks']:
        wq, wk, wv = jnp.split(bp['in_proj_w'], 3, axis=0)   # each (H, H), torch (out,in)
        bq, bk, bv = jnp.split(bp['in_proj_b'], 3)           # each (H,)
        lnp_rows += [bp['ln1_g'], bp['ln1_b'], bp['ln2_g'], bp['ln2_b']]
        for w, b in ((wq, bq), (wk, bk), (wv, bv)):
            wt = w.T                                          # y = x @ w.T
            for h in range(NH):
                lo, hi = h * HD, (h + 1) * HD
                wqkv.append(wt[:, lo:hi])                     # (H, HD)
                bqkv.append(b[lo:hi].reshape(1, HD))
        wo_t = bp['out_proj_w'].T                             # (H, H)
        for h in range(NH):
            wo.append(wo_t[h * HD:(h + 1) * HD, :])           # (HD, H)
        bo.append(bp['out_proj_b'].reshape(1, H))
        wff.append(bp['conv1_w'].T)
        wff.append(bp['conv2_w'].T)
        bff.append(bp['conv1_b'].reshape(1, H))
        bff.append(bp['conv2_b'].reshape(1, H))
    lnp_rows += [params['last_g'], params['last_b']]
    lnp = jnp.stack(lnp_rows, axis=0).reshape(-1, 1, H)       # (4*NB+2, 1, H)
    return (lnp,
            jnp.stack(wqkv, 0),        # (NB*3*NH, H, HD)
            jnp.stack(bqkv, 0),        # (NB*3*NH, 1, HD)
            jnp.stack(wo, 0),          # (NB*NH, HD, H)
            jnp.stack(bo, 0),          # (NB, 1, H)
            jnp.stack(wff, 0),         # (NB*2, H, H)
            jnp.stack(bff, 0))         # (NB*2, 1, H)


def _pick_batch_tile(batch, seq_len):
    """Largest batch tile that (a) divides batch, (b) keeps ~128 rows/step,
    (c) leaves >=2 grid steps so the parallel axis can use both v7x cores."""
    cap = max(1, 128 // max(seq_len, 1))
    if batch >= 2:
        cap = min(cap, max(1, batch // 2))
    cap = max(1, min(cap, batch))
    for t in range(cap, 0, -1):
        if batch % t == 0:
            return t
    return 1


# ----------------------------- wrapper --------------------------------------

def farf_forward(params, user_ids, log_seqs, pos_seqs, neg_seqs, batch_tile=None):
    """mode='default' forward: returns (pos_logits, neg_logits), each (B, S)."""
    del user_ids  # unused by the torch model as well
    B, S = log_seqs.shape
    H = HIDDEN
    TB = batch_tile if batch_tile is not None else _pick_batch_tile(B, S)

    # embedding lookups + position add + timeline mask (stay in plain JAX)
    seqs = params['item_emb'][log_seqs] * math.sqrt(H)            # (B, S, H)
    seqs = seqs + params['pos_emb'][None, :S, :]
    mask = (log_seqs != 0).astype(jnp.float32)[..., None]         # (B, S, 1)
    seqs = seqs * mask
    pos_e = params['item_emb'][pos_seqs]                          # (B, S, H)
    neg_e = params['item_emb'][neg_seqs]

    packed = _pack_weights(params)
    lnp, wqkv, bqkv, wo, bo, wff, bff = packed

    bmap = lambda b: (b, 0, 0)     # batch-tiled arrays
    wmap = lambda b: (0, 0, 0)     # resident weights (same block every step)

    n_rows = B * S
    weight_bytes = sum(int(a.size) * 4 for a in packed)
    cost = pl.CostEstimate(
        flops=int(2 * n_rows * H * H * 6 * NUM_BLOCKS
                  + 4 * B * NUM_HEADS * S * S * HEAD_DIM * NUM_BLOCKS
                  + 4 * n_rows * H),
        transcendentals=int(B * NUM_HEADS * S * S * NUM_BLOCKS),
        bytes_accessed=int(4 * (3 * n_rows * H + n_rows + 2 * B * S) + weight_bytes),
    )

    out = pl.pallas_call(
        _farf_kernel,
        grid=(B // TB,),
        in_specs=[
            pl.BlockSpec((TB, S, H), bmap),        # seqs
            pl.BlockSpec((TB, S, 1), bmap),        # timeline mask
            pl.BlockSpec((TB, S, H), bmap),        # pos embeddings
            pl.BlockSpec((TB, S, H), bmap),        # neg embeddings
            pl.BlockSpec(lnp.shape, wmap),         # LN params
            pl.BlockSpec(wqkv.shape, wmap),        # per-head q/k/v weights
            pl.BlockSpec(bqkv.shape, wmap),        # per-head q/k/v biases
            pl.BlockSpec(wo.shape, wmap),          # per-head out-proj weights
            pl.BlockSpec(bo.shape, wmap),          # out-proj bias
            pl.BlockSpec(wff.shape, wmap),         # FFN weights
            pl.BlockSpec(bff.shape, wmap),         # FFN biases
        ],
        out_specs=pl.BlockSpec((TB, 2, S), lambda b: (b, 0, 0)),
        out_shape=jax.ShapeDtypeStruct((B, 2, S), jnp.float32),
        compiler_params=pltpu.CompilerParams(
            dimension_semantics=("parallel",)),
        cost_estimate=cost,
    )(seqs, mask, pos_e, neg_e, lnp, wqkv, bqkv, wo, bo, wff, bff)

    return out[:, 0, :], out[:, 1, :]


# ----------------------------- reference (pure JAX) ------------------------

def _ref_ln(x, g, b):
    mu = jnp.mean(x, axis=-1, keepdims=True)
    var = jnp.mean((x - mu) ** 2, axis=-1, keepdims=True)
    return (x - mu) * jax.lax.rsqrt(var + LN_EPS) * g + b


def ref_forward(params, user_ids, log_seqs, pos_seqs, neg_seqs):
    del user_ids
    B, S = log_seqs.shape
    seqs = params['item_emb'][log_seqs] * math.sqrt(HIDDEN)
    seqs = seqs + params['pos_emb'][None, :S, :]
    mask = (log_seqs != 0).astype(jnp.float32)[..., None]
    seqs = seqs * mask
    bias = jnp.where(jnp.tril(jnp.ones((S, S), dtype=bool)), 0.0, NEG_INF)
    for bp in params['blocks']:
        wq, wk, wv = jnp.split(bp['in_proj_w'], 3, axis=0)
        bq, bk, bv = jnp.split(bp['in_proj_b'], 3)
        q_in = _ref_ln(seqs, bp['ln1_g'], bp['ln1_b'])
        q = q_in @ wq.T + bq
        k = seqs @ wk.T + bk
        v = seqs @ wv.T + bv
        outs = []
        for h in range(NUM_HEADS):
            sl = slice(h * HEAD_DIM, (h + 1) * HEAD_DIM)
            s = (q[..., sl] / math.sqrt(HEAD_DIM)) @ jnp.swapaxes(k[..., sl], -1, -2) + bias
            outs.append(jax.nn.softmax(s, axis=-1) @ v[..., sl])
        attn = jnp.concatenate(outs, axis=-1) @ bp['out_proj_w'].T + bp['out_proj_b']
        seqs = q_in + attn
        y = _ref_ln(seqs, bp['ln2_g'], bp['ln2_b'])
        h1 = jax.nn.relu(y @ bp['conv1_w'].T + bp['conv1_b'])
        ff = h1 @ bp['conv2_w'].T + bp['conv2_b'] + y
        seqs = ff * mask
    feats = _ref_ln(seqs, params['last_g'], params['last_b'])
    pos_embs = params['item_emb'][pos_seqs]
    neg_embs = params['item_emb'][neg_seqs]
    return (feats * pos_embs).sum(-1), (feats * neg_embs).sum(-1)


# ----------------------------- params -------------------------------------

def init_params(key):
    ks = jax.random.split(key, 2 + NUM_BLOCKS)
    item_emb = 0.1 * jax.random.normal(ks[0], (ITEM_NUM + 1, HIDDEN), jnp.float32)
    item_emb = item_emb.at[0].set(0.0)                 # padding_idx = 0
    pos_emb = 0.1 * jax.random.normal(ks[1], (MAXLEN, HIDDEN), jnp.float32)
    blocks = []
    for i in range(NUM_BLOCKS):
        bk = jax.random.split(ks[2 + i], 8)
        blocks.append(dict(
            ln1_g=jnp.ones((HIDDEN,), jnp.float32),
            ln1_b=jnp.zeros((HIDDEN,), jnp.float32),
            in_proj_w=0.1 * jax.random.normal(bk[0], (3 * HIDDEN, HIDDEN), jnp.float32),
            in_proj_b=0.1 * jax.random.normal(bk[1], (3 * HIDDEN,), jnp.float32),
            out_proj_w=0.1 * jax.random.normal(bk[2], (HIDDEN, HIDDEN), jnp.float32),
            out_proj_b=0.1 * jax.random.normal(bk[3], (HIDDEN,), jnp.float32),
            ln2_g=jnp.ones((HIDDEN,), jnp.float32),
            ln2_b=jnp.zeros((HIDDEN,), jnp.float32),
            conv1_w=0.1 * jax.random.normal(bk[4], (HIDDEN, HIDDEN), jnp.float32),
            conv1_b=0.1 * jax.random.normal(bk[5], (HIDDEN,), jnp.float32),
            conv2_w=0.1 * jax.random.normal(bk[6], (HIDDEN, HIDDEN), jnp.float32),
            conv2_b=0.1 * jax.random.normal(bk[7], (HIDDEN,), jnp.float32),
        ))
    return dict(item_emb=item_emb, pos_emb=pos_emb, blocks=blocks,
                last_g=jnp.ones((HIDDEN,), jnp.float32),
                last_b=jnp.zeros((HIDDEN,), jnp.float32))


# ----------------------------- main ----------------------------------------

if __name__ == "__main__":
    key = jax.random.PRNGKey(0)
    pkey, dkey = jax.random.split(key)
    params = init_params(pkey)

    B, S = 2, MAXLEN
    k1, k2, k3 = jax.random.split(dkey, 3)
    user_ids = jnp.arange(B, dtype=jnp.int32)
    log_seqs = jax.random.randint(k1, (B, S), 0, ITEM_NUM + 1)
    log_seqs = log_seqs.at[:, :2].set(0)               # left padding, like real data
    pos_seqs = jax.random.randint(k2, (B, S), 1, ITEM_NUM + 1)
    neg_seqs = jax.random.randint(k3, (B, S), 1, ITEM_NUM + 1)

    pos_logits, neg_logits = farf_forward(params, user_ids, log_seqs, pos_seqs, neg_seqs)
    jax.block_until_ready((pos_logits, neg_logits))

    # sanity check against a pure-JAX reference of the same math
    ref_pos, ref_neg = ref_forward(params, user_ids, log_seqs, pos_seqs, neg_seqs)
    assert pos_logits.shape == (B, S) and neg_logits.shape == (B, S)
    assert jnp.allclose(pos_logits, ref_pos, atol=1e-3, rtol=1e-3)
    assert jnp.allclose(neg_logits, ref_neg, atol=1e-3, rtol=1e-3)

    print("KERNEL_OK")
</pallas_src>

<mosaic_0001>
module attributes {stable_mosaic.version = 11 : i64} {
  func.func @_farf_kernel(%arg0: i32, %arg1: memref<1x8x32xf32, #tpu.memory_space<vmem>>, %arg2: memref<1x8x1xf32, #tpu.memory_space<vmem>>, %arg3: memref<1x8x32xf32, #tpu.memory_space<vmem>>, %arg4: memref<1x8x32xf32, #tpu.memory_space<vmem>>, %arg5: memref<10x1x32xf32, #tpu.memory_space<vmem>>, %arg6: memref<12x32x16xf32, #tpu.memory_space<vmem>>, %arg7: memref<12x1x16xf32, #tpu.memory_space<vmem>>, %arg8: memref<4x16x32xf32, #tpu.memory_space<vmem>>, %arg9: memref<2x1x32xf32, #tpu.memory_space<vmem>>, %arg10: memref<4x32x32xf32, #tpu.memory_space<vmem>>, %arg11: memref<4x1x32xf32, #tpu.memory_space<vmem>>, %arg12: memref<1x2x8xf32, #tpu.memory_space<vmem>>) attributes {dimension_semantics = [#tpu.dimension_semantics<parallel>], iteration_bounds = array<i64: 2>, scalar_prefetch = 0 : i64, scratch_operands = 0 : i64, tpu.core_type = #tpu.core_type<tc>, window_params = [{transform_indices = @transform_0, window_bounds = array<i64: 1, 8, 32>}, {transform_indices = @transform_1, window_bounds = array<i64: 1, 8, 1>}, {transform_indices = @transform_2, window_bounds = array<i64: 1, 8, 32>}, {transform_indices = @transform_3, window_bounds = array<i64: 1, 8, 32>}, {pipeline_mode = #tpu.pipeline_mode<synchronous>, transform_indices = @transform_4, window_bounds = array<i64: 10, 1, 32>}, {pipeline_mode = #tpu.pipeline_mode<synchronous>, transform_indices = @transform_5, window_bounds = array<i64: 12, 32, 16>}, {pipeline_mode = #tpu.pipeline_mode<synchronous>, transform_indices = @transform_6, window_bounds = array<i64: 12, 1, 16>}, {pipeline_mode = #tpu.pipeline_mode<synchronous>, transform_indices = @transform_7, window_bounds = array<i64: 4, 16, 32>}, {pipeline_mode = #tpu.pipeline_mode<synchronous>, transform_indices = @transform_8, window_bounds = array<i64: 2, 1, 32>}, {pipeline_mode = #tpu.pipeline_mode<synchronous>, transform_indices = @transform_9, window_bounds = array<i64: 4, 32, 32>}, {pipeline_mode = #tpu.pipeline_mode<synchronous>, transform_indices = @transform_10, window_bounds = array<i64: 4, 1, 32>}, {transform_indices = @transform_11, window_bounds = array<i64: 1, 2, 8>}]} {
    %c0 = arith.constant 0 : index
    %c0_0 = arith.constant 0 : index
    %c0_1 = arith.constant 0 : index
    %0 = vector.load %arg1[%c0, %c0_0, %c0_1] : memref<1x8x32xf32, #tpu.memory_space<vmem>>, vector<1x8x32xf32>
    %1 = vector.shape_cast %0 : vector<1x8x32xf32> to vector<8x32xf32>
    %c0_2 = arith.constant 0 : index
    %c0_3 = arith.constant 0 : index
    %c0_4 = arith.constant 0 : index
    %2 = vector.load %arg2[%c0_2, %c0_3, %c0_4] : memref<1x8x1xf32, #tpu.memory_space<vmem>>, vector<1x8x1xf32>
    %3 = vector.shape_cast %2 : vector<1x8x1xf32> to vector<8x1xf32>
    %4 = tpu.iota {dimensions = array<i32: 0>} : vector<8x8xi32>
    %5 = tpu.iota {dimensions = array<i32: 1>} : vector<8x8xi32>
    %6 = arith.cmpi sge, %4, %5 : vector<8x8xi32>
    %cst = arith.constant 0.000000e+00 : f32
    %cst_5 = arith.constant -1.000000e+30 : f32
    %7 = vector.broadcast %cst : f32 to vector<8x8xf32>
    %8 = vector.broadcast %cst_5 : f32 to vector<8x8xf32>
    %9 = arith.select %6, %7, %8 : vector<8x8xi1>, vector<8x8xf32>
    %c0_6 = arith.constant 0 : index
    %c0_7 = arith.constant 0 : index
    %c0_8 = arith.constant 0 : index
    %10 = vector.load %arg5[%c0_6, %c0_7, %c0_8] : memref<10x1x32xf32, #tpu.memory_space<vmem>>, vector<1x1x32xf32>
    %11 = vector.shape_cast %10 : vector<1x1x32xf32> to vector<1x32xf32>
    %c1 = arith.constant 1 : index
    %c0_9 = arith.constant 0 : index
    %c0_10 = arith.constant 0 : index
    %12 = vector.load %arg5[%c1, %c0_9, %c0_10] : memref<10x1x32xf32, #tpu.memory_space<vmem>>, vector<1x1x32xf32>
    %13 = vector.shape_cast %12 : vector<1x1x32xf32> to vector<1x32xf32>
    %c2 = arith.constant 2 : index
    %c0_11 = arith.constant 0 : index
    %c0_12 = arith.constant 0 : index
    %14 = vector.load %arg5[%c2, %c0_11, %c0_12] : memref<10x1x32xf32, #tpu.memory_space<vmem>>, vector<1x1x32xf32>
    %15 = vector.shape_cast %14 : vector<1x1x32xf32> to vector<1x32xf32>
    %c3 = arith.constant 3 : index
    %c0_13 = arith.constant 0 : index
    %c0_14 = arith.constant 0 : index
    %16 = vector.load %arg5[%c3, %c0_13, %c0_14] : memref<10x1x32xf32, #tpu.memory_space<vmem>>, vector<1x1x32xf32>
    %17 = vector.shape_cast %16 : vector<1x1x32xf32> to vector<1x32xf32>
    %cst_15 = arith.constant dense<0.000000e+00> : vector<8xf32>
    %18 = vector.multi_reduction <add>, %1, %cst_15 [1] : vector<8x32xf32> to vector<8xf32>
    %19 = vector.shape_cast %18 : vector<8xf32> to vector<8x1xf32>
    %cst_16 = arith.constant 3.200000e+01 : f32
    %20 = vector.broadcast %cst_16 : f32 to vector<8x1xf32>
    %21 = arith.divf %19, %20 : vector<8x1xf32>
    %22 = vector.broadcast %21 : vector<8x1xf32> to vector<8x32xf32>
    %23 = arith.subf %1, %22 : vector<8x32xf32>
    %24 = arith.mulf %23, %23 : vector<8x32xf32>
    %cst_17 = arith.constant dense<0.000000e+00> : vector<8xf32>
    %25 = vector.multi_reduction <add>, %24, %cst_17 [1] : vector<8x32xf32> to vector<8xf32>
    %26 = vector.shape_cast %25 : vector<8xf32> to vector<8x1xf32>
    %cst_18 = arith.constant 3.200000e+01 : f32
    %27 = vector.broadcast %cst_18 : f32 to vector<8x1xf32>
    %28 = arith.divf %26, %27 : vector<8x1xf32>
    %29 = vector.broadcast %21 : vector<8x1xf32> to vector<8x32xf32>
    %30 = arith.subf %1, %29 : vector<8x32xf32>
    %cst_19 = arith.constant 9.99999993E-9 : f32
    %31 = vector.broadcast %cst_19 : f32 to vector<8x1xf32>
    %32 = arith.addf %28, %31 : vector<8x1xf32>
    %33 = math.rsqrt %32 : vector<8x1xf32>
    %34 = vector.broadcast %33 : vector<8x1xf32> to vector<8x32xf32>
    %35 = arith.mulf %30, %34 : vector<8x32xf32>
    %36 = vector.broadcast %11 : vector<1x32xf32> to vector<8x32xf32>
    %37 = arith.mulf %35, %36 : vector<8x32xf32>
    %38 = vector.broadcast %13 : vector<1x32xf32> to vector<8x32xf32>
    %39 = arith.addf %37, %38 : vector<8x32xf32>
    %cst_20 = arith.constant 0.000000e+00 : f32
    %40 = vector.broadcast %cst_20 : f32 to vector<8x32xf32>
    %c0_21 = arith.constant 0 : index
    %c0_22 = arith.constant 0 : index
    %c0_23 = arith.constant 0 : index
    %41 = vector.load %arg6[%c0_21, %c0_22, %c0_23] : memref<12x32x16xf32, #tpu.memory_space<vmem>>, vector<1x32x16xf32>
    %42 = vector.shape_cast %41 : vector<1x32x16xf32> to vector<32x16xf32>
    %cst_24 = arith.constant dense<0.000000e+00> : vector<8x16xf32>
    %43 = tpu.matmul %39, %42, %cst_24 {dimension_numbers = #tpu.dot_dimension_numbers<[1], [0], [0], [1], [0, 0, 1, 1], [], []>} : vector<8x32xf32>, vector<32x16xf32>, vector<8x16xf32> -> vector<8x16xf32>
    %c0_25 = arith.constant 0 : index
    %c0_26 = arith.constant 0 : index
    %c0_27 = arith.constant 0 : index
    %44 = vector.load %arg7[%c0_25, %c0_26, %c0_27] : memref<12x1x16xf32, #tpu.memory_space<vmem>>, vector<1x1x16xf32>
    %45 = vector.shape_cast %44 : vector<1x1x16xf32> to vector<1x16xf32>
    %46 = vector.broadcast %45 : vector<1x16xf32> to vector<8x16xf32>
    %47 = arith.addf %43, %46 : vector<8x16xf32>
    %c2_28 = arith.constant 2 : index
    %c0_29 = arith.constant 0 : index
    %c0_30 = arith.constant 0 : index
    %48 = vector.load %arg6[%c2_28, %c0_29, %c0_30] : memref<12x32x16xf32, #tpu.memory_space<vmem>>, vector<1x32x16xf32>
    %49 = vector.shape_cast %48 : vector<1x32x16xf32> to vector<32x16xf32>
    %cst_31 = arith.constant dense<0.000000e+00> : vector<8x16xf32>
    %50 = tpu.matmul %1, %49, %cst_31 {dimension_numbers = #tpu.dot_dimension_numbers<[1], [0], [0], [1], [0, 0, 1, 1], [], []>} : vector<8x32xf32>, vector<32x16xf32>, vector<8x16xf32> -> vector<8x16xf32>
    %c2_32 = arith.constant 2 : index
    %c0_33 = arith.constant 0 : index
    %c0_34 = arith.constant 0 : index
    %51 = vector.load %arg7[%c2_32, %c0_33, %c0_34] : memref<12x1x16xf32, #tpu.memory_space<vmem>>, vector<1x1x16xf32>
    %52 = vector.shape_cast %51 : vector<1x1x16xf32> to vector<1x16xf32>
    %53 = vector.broadcast %52 : vector<1x16xf32> to vector<8x16xf32>
    %54 = arith.addf %50, %53 : vector<8x16xf32>
    %c4 = arith.constant 4 : index
    %c0_35 = arith.constant 0 : index
    %c0_36 = arith.constant 0 : index
    %55 = vector.load %arg6[%c4, %c0_35, %c0_36] : memref<12x32x16xf32, #tpu.memory_space<vmem>>, vector<1x32x16xf32>
    %56 = vector.shape_cast %55 : vector<1x32x16xf32> to vector<32x16xf32>
    %cst_37 = arith.constant dense<0.000000e+00> : vector<8x16xf32>
    %57 = tpu.matmul %1, %56, %cst_37 {dimension_numbers = #tpu.dot_dimension_numbers<[1], [0], [0], [1], [0, 0, 1, 1], [], []>} : vector<8x32xf32>, vector<32x16xf32>, vector<8x16xf32> -> vector<8x16xf32>
    %c4_38 = arith.constant 4 : index
    %c0_39 = arith.constant 0 : index
    %c0_40 = arith.constant 0 : index
    %58 = vector.load %arg7[%c4_38, %c0_39, %c0_40] : memref<12x1x16xf32, #tpu.memory_space<vmem>>, vector<1x1x16xf32>
    %59 = vector.shape_cast %58 : vector<1x1x16xf32> to vector<1x16xf32>
    %60 = vector.broadcast %59 : vector<1x16xf32> to vector<8x16xf32>
    %61 = arith.addf %57, %60 : vector<8x16xf32>
    %cst_41 = arith.constant 2.500000e-01 : f32
    %62 = vector.broadcast %cst_41 : f32 to vector<8x16xf32>
    %63 = arith.mulf %47, %62 : vector<8x16xf32>
    %64 = vector.shape_cast %63 : vector<8x16xf32> to vector<1x8x16xf32>
    %65 = vector.shape_cast %54 : vector<8x16xf32> to vector<1x8x16xf32>
    %66 = vector.shape_cast %61 : vector<8x16xf32> to vector<1x8x16xf32>
    "tpu.trace_start"() <{level = 10 : i32, message = "bqd,bkd->bqk"}> : () -> ()
    %cst_42 = arith.constant dense<0.000000e+00> : vector<1x8x8xf32>
    %67 = tpu.matmul %64, %65, %cst_42 {dimension_numbers = #tpu.dot_dimension_numbers<[2], [2], [1], [1], [0, 0, 0, 1, 1, 1], [0], [0]>} : vector<1x8x16xf32>, vector<1x8x16xf32>, vector<1x8x8xf32> -> vector<1x8x8xf32>
    "tpu.trace_stop"() : () -> ()
    %68 = vector.shape_cast %9 : vector<8x8xf32> to vector<1x8x8xf32>
    %69 = arith.addf %67, %68 : vector<1x8x8xf32>
    %cst_43 = arith.constant dense<0xFF800000> : vector<1x8xf32>
    %70 = vector.multi_reduction <maximumf>, %69, %cst_43 [2] : vector<1x8x8xf32> to vector<1x8xf32>
    %71 = vector.shape_cast %70 : vector<1x8xf32> to vector<1x8x1xf32>
    %72 = vector.broadcast %71 : vector<1x8x1xf32> to vector<1x8x8xf32>
    %73 = arith.subf %69, %72 : vector<1x8x8xf32>
    %74 = math.exp %73 : vector<1x8x8xf32>
    %cst_44 = arith.constant dense<0.000000e+00> : vector<1x8xf32>
    %75 = vector.multi_reduction <add>, %74, %cst_44 [2] : vector<1x8x8xf32> to vector<1x8xf32>
    %76 = vector.shape_cast %75 : vector<1x8xf32> to vector<1x8x1xf32>
    %77 = vector.broadcast %76 : vector<1x8x1xf32> to vector<1x8x8xf32>
    %78 = arith.divf %74, %77 : vector<1x8x8xf32>
    "tpu.trace_start"() <{level = 10 : i32, message = "bqk,bkd->bqd"}> : () -> ()
    %cst_45 = arith.constant dense<0.000000e+00> : vector<1x8x16xf32>
    %79 = tpu.matmul %78, %66, %cst_45 {dimension_numbers = #tpu.dot_dimension_numbers<[2], [1], [1], [2], [0, 0, 0, 1, 1, 2], [0], [0]>} : vector<1x8x8xf32>, vector<1x8x16xf32>, vector<1x8x16xf32> -> vector<1x8x16xf32>
    "tpu.trace_stop"() : () -> ()
    %80 = vector.shape_cast %79 : vector<1x8x16xf32> to vector<8x16xf32>
    %c0_46 = arith.constant 0 : index
    %c0_47 = arith.constant 0 : index
    %c0_48 = arith.constant 0 : index
    %81 = vector.load %arg8[%c0_46, %c0_47, %c0_48] : memref<4x16x32xf32, #tpu.memory_space<vmem>>, vector<1x16x32xf32>
    %82 = vector.shape_cast %81 : vector<1x16x32xf32> to vector<16x32xf32>
    %cst_49 = arith.constant dense<0.000000e+00> : vector<8x32xf32>
    %83 = tpu.matmul %80, %82, %cst_49 {dimension_numbers = #tpu.dot_dimension_numbers<[1], [0], [0], [1], [0, 0, 1, 1], [], []>} : vector<8x16xf32>, vector<16x32xf32>, vector<8x32xf32> -> vector<8x32xf32>
    %84 = arith.addf %40, %83 : vector<8x32xf32>
    %c1_50 = arith.constant 1 : index
    %c0_51 = arith.constant 0 : index
    %c0_52 = arith.constant 0 : index
    %85 = vector.load %arg6[%c1_50, %c0_51, %c0_52] : memref<12x32x16xf32, #tpu.memory_space<vmem>>, vector<1x32x16xf32>
    %86 = vector.shape_cast %85 : vector<1x32x16xf32> to vector<32x16xf32>
    %cst_53 = arith.constant dense<0.000000e+00> : vector<8x16xf32>
    %87 = tpu.matmul %39, %86, %cst_53 {dimension_numbers = #tpu.dot_dimension_numbers<[1], [0], [0], [1], [0, 0, 1, 1], [], []>} : vector<8x32xf32>, vector<32x16xf32>, vector<8x16xf32> -> vector<8x16xf32>
    %c1_54 = arith.constant 1 : index
    %c0_55 = arith.constant 0 : index
    %c0_56 = arith.constant 0 : index
    %88 = vector.load %arg7[%c1_54, %c0_55, %c0_56] : memref<12x1x16xf32, #tpu.memory_space<vmem>>, vector<1x1x16xf32>
    %89 = vector.shape_cast %88 : vector<1x1x16xf32> to vector<1x16xf32>
    %90 = vector.broadcast %89 : vector<1x16xf32> to vector<8x16xf32>
    %91 = arith.addf %87, %90 : vector<8x16xf32>
    %c3_57 = arith.constant 3 : index
    %c0_58 = arith.constant 0 : index
    %c0_59 = arith.constant 0 : index
    %92 = vector.load %arg6[%c3_57, %c0_58, %c0_59] : memref<12x32x16xf32, #tpu.memory_space<vmem>>, vector<1x32x16xf32>
    %93 = vector.shape_cast %92 : vector<1x32x16xf32> to vector<32x16xf32>
    %cst_60 = arith.constant dense<0.000000e+00> : vector<8x16xf32>
    %94 = tpu.matmul %1, %93, %cst_60 {dimension_numbers = #tpu.dot_dimension_numbers<[1], [0], [0], [1], [0, 0, 1, 1], [], []>} : vector<8x32xf32>, vector<32x16xf32>, vector<8x16xf32> -> vector<8x16xf32>
    %c3_61 = arith.constant 3 : index
    %c0_62 = arith.constant 0 : index
    %c0_63 = arith.constant 0 : index
    %95 = vector.load %arg7[%c3_61, %c0_62, %c0_63] : memref<12x1x16xf32, #tpu.memory_space<vmem>>, vector<1x1x16xf32>
    %96 = vector.shape_cast %95 : vector<1x1x16xf32> to vector<1x16xf32>
    %97 = vector.broadcast %96 : vector<1x16xf32> to vector<8x16xf32>
    %98 = arith.addf %94, %97 : vector<8x16xf32>
    %c5 = arith.constant 5 : index
    %c0_64 = arith.constant 0 : index
    %c0_65 = arith.constant 0 : index
    %99 = vector.load %arg6[%c5, %c0_64, %c0_65] : memref<12x32x16xf32, #tpu.memory_space<vmem>>, vector<1x32x16xf32>
    %100 = vector.shape_cast %99 : vector<1x32x16xf32> to vector<32x16xf32>
    %cst_66 = arith.constant dense<0.000000e+00> : vector<8x16xf32>
    %101 = tpu.matmul %1, %100, %cst_66 {dimension_numbers = #tpu.dot_dimension_numbers<[1], [0], [0], [1], [0, 0, 1, 1], [], []>} : vector<8x32xf32>, vector<32x16xf32>, vector<8x16xf32> -> vector<8x16xf32>
    %c5_67 = arith.constant 5 : index
    %c0_68 = arith.constant 0 : index
    %c0_69 = arith.constant 0 : index
    %102 = vector.load %arg7[%c5_67, %c0_68, %c0_69] : memref<12x1x16xf32, #tpu.memory_space<vmem>>, vector<1x1x16xf32>
    %103 = vector.shape_cast %102 : vector<1x1x16xf32> to vector<1x16xf32>
    %104 = vector.broadcast %103 : vector<1x16xf32> to vector<8x16xf32>
    %105 = arith.addf %101, %104 : vector<8x16xf32>
    %cst_70 = arith.constant 2.500000e-01 : f32
    %106 = vector.broadcast %cst_70 : f32 to vector<8x16xf32>
    %107 = arith.mulf %91, %106 : vector<8x16xf32>
    %108 = vector.shape_cast %107 : vector<8x16xf32> to vector<1x8x16xf32>
    %109 = vector.shape_cast %98 : vector<8x16xf32> to vector<1x8x16xf32>
    %110 = vector.shape_cast %105 : vector<8x16xf32> to vector<1x8x16xf32>
    "tpu.trace_start"() <{level = 10 : i32, message = "bqd,bkd->bqk"}> : () -> ()
    %cst_71 = arith.constant dense<0.000000e+00> : vector<1x8x8xf32>
    %111 = tpu.matmul %108, %109, %cst_71 {dimension_numbers = #tpu.dot_dimension_numbers<[2], [2], [1], [1], [0, 0, 0, 1, 1, 1], [0], [0]>} : vector<1x8x16xf32>, vector<1x8x16xf32>, vector<1x8x8xf32> -> vector<1x8x8xf32>
    "tpu.trace_stop"() : () -> ()
    %112 = vector.shape_cast %9 : vector<8x8xf32> to vector<1x8x8xf32>
    %113 = arith.addf %111, %112 : vector<1x8x8xf32>
    %cst_72 = arith.constant dense<0xFF800000> : vector<1x8xf32>
    %114 = vector.multi_reduction <maximumf>, %113, %cst_72 [2] : vector<1x8x8xf32> to vector<1x8xf32>
    %115 = vector.shape_cast %114 : vector<1x8xf32> to vector<1x8x1xf32>
    %116 = vector.broadcast %115 : vector<1x8x1xf32> to vector<1x8x8xf32>
    %117 = arith.subf %113, %116 : vector<1x8x8xf32>
    %118 = math.exp %117 : vector<1x8x8xf32>
    %cst_73 = arith.constant dense<0.000000e+00> : vector<1x8xf32>
    %119 = vector.multi_reduction <add>, %118, %cst_73 [2] : vector<1x8x8xf32> to vector<1x8xf32>
    %120 = vector.shape_cast %119 : vector<1x8xf32> to vector<1x8x1xf32>
    %121 = vector.broadcast %120 : vector<1x8x1xf32> to vector<1x8x8xf32>
    %122 = arith.divf %118, %121 : vector<1x8x8xf32>
    "tpu.trace_start"() <{level = 10 : i32, message = "bqk,bkd->bqd"}> : () -> ()
    %cst_74 = arith.constant dense<0.000000e+00> : vector<1x8x16xf32>
    %123 = tpu.matmul %122, %110, %cst_74 {dimension_numbers = #tpu.dot_dimension_numbers<[2], [1], [1], [2], [0, 0, 0, 1, 1, 2], [0], [0]>} : vector<1x8x8xf32>, vector<1x8x16xf32>, vector<1x8x16xf32> -> vector<1x8x16xf32>
    "tpu.trace_stop"() : () -> ()
    %124 = vector.shape_cast %123 : vector<1x8x16xf32> to vector<8x16xf32>
    %c1_75 = arith.constant 1 : index
    %c0_76 = arith.constant 0 : index
    %c0_77 = arith.constant 0 : index
    %125 = vector.load %arg8[%c1_75, %c0_76, %c0_77] : memref<4x16x32xf32, #tpu.memory_space<vmem>>, vector<1x16x32xf32>
    %126 = vector.shape_cast %125 : vector<1x16x32xf32> to vector<16x32xf32>
    %cst_78 = arith.constant dense<0.000000e+00> : vector<8x32xf32>
    %127 = tpu.matmul %124, %126, %cst_78 {dimension_numbers = #tpu.dot_dimension_numbers<[1], [0], [0], [1], [0, 0, 1, 1], [], []>} : vector<8x16xf32>, vector<16x32xf32>, vector<8x32xf32> -> vector<8x32xf32>
    %128 = arith.addf %84, %127 : vector<8x32xf32>
    %c0_79 = arith.constant 0 : index
    %c0_80 = arith.constant 0 : index
    %c0_81 = arith.constant 0 : index
    %129 = vector.load %arg9[%c0_79, %c0_80, %c0_81] : memref<2x1x32xf32, #tpu.memory_space<vmem>>, vector<1x1x32xf32>
    %130 = vector.shape_cast %129 : vector<1x1x32xf32> to vector<1x32xf32>
    %131 = vector.broadcast %130 : vector<1x32xf32> to vector<8x32xf32>
    %132 = arith.addf %128, %131 : vector<8x32xf32>
    %133 = arith.addf %39, %132 : vector<8x32xf32>
    %cst_82 = arith.constant dense<0.000000e+00> : vector<8xf32>
    %134 = vector.multi_reduction <add>, %133, %cst_82 [1] : vector<8x32xf32> to vector<8xf32>
    %135 = vector.shape_cast %134 : vector<8xf32> to vector<8x1xf32>
    %cst_83 = arith.constant 3.200000e+01 : f32
    %136 = vector.broadcast %cst_83 : f32 to vector<8x1xf32>
    %137 = arith.divf %135, %136 : vector<8x1xf32>
    %138 = vector.broadcast %137 : vector<8x1xf32> to vector<8x32xf32>
    %139 = arith.subf %133, %138 : vector<8x32xf32>
    %140 = arith.mulf %139, %139 : vector<8x32xf32>
    %cst_84 = arith.constant dense<0.000000e+00> : vector<8xf32>
    %141 = vector.multi_reduction <add>, %140, %cst_84 [1] : vector<8x32xf32> to vector<8xf32>
    %142 = vector.shape_cast %141 : vector<8xf32> to vector<8x1xf32>
    %cst_85 = arith.constant 3.200000e+01 : f32
    %143 = vector.broadcast %cst_85 : f32 to vector<8x1xf32>
    %144 = arith.divf %142, %143 : vector<8x1xf32>
    %145 = vector.broadcast %137 : vector<8x1xf32> to vector<8x32xf32>
    %146 = arith.subf %133, %145 : vector<8x32xf32>
    %cst_86 = arith.constant 9.99999993E-9 : f32
    %147 = vector.broadcast %cst_86 : f32 to vector<8x1xf32>
    %148 = arith.addf %144, %147 : vector<8x1xf32>
    %149 = math.rsqrt %148 : vector<8x1xf32>
    %150 = vector.broadcast %149 : vector<8x1xf32> to vector<8x32xf32>
    %151 = arith.mulf %146, %150 : vector<8x32xf32>
    %152 = vector.broadcast %15 : vector<1x32xf32> to vector<8x32xf32>
    %153 = arith.mulf %151, %152 : vector<8x32xf32>
    %154 = vector.broadcast %17 : vector<1x32xf32> to vector<8x32xf32>
    %155 = arith.addf %153, %154 : vector<8x32xf32>
    %c0_87 = arith.constant 0 : index
    %c0_88 = arith.constant 0 : index
    %c0_89 = arith.constant 0 : index
    %156 = vector.load %arg10[%c0_87, %c0_88, %c0_89] : memref<4x32x32xf32, #tpu.memory_space<vmem>>, vector<1x32x32xf32>
    %157 = vector.shape_cast %156 : vector<1x32x32xf32> to vector<32x32xf32>
    %cst_90 = arith.constant dense<0.000000e+00> : vector<8x32xf32>
    %158 = tpu.matmul %155, %157, %cst_90 {dimension_numbers = #tpu.dot_dimension_numbers<[1], [0], [0], [1], [0, 0, 1, 1], [], []>} : vector<8x32xf32>, vector<32x32xf32>, vector<8x32xf32> -> vector<8x32xf32>
    %c0_91 = arith.constant 0 : index
    %c0_92 = arith.constant 0 : index
    %c0_93 = arith.constant 0 : index
    %159 = vector.load %arg11[%c0_91, %c0_92, %c0_93] : memref<4x1x32xf32, #tpu.memory_space<vmem>>, vector<1x1x32xf32>
    %160 = vector.shape_cast %159 : vector<1x1x32xf32> to vector<1x32xf32>
    %161 = vector.broadcast %160 : vector<1x32xf32> to vector<8x32xf32>
    %162 = arith.addf %158, %161 : vector<8x32xf32>
    %cst_94 = arith.constant 0.000000e+00 : f32
    %163 = vector.broadcast %cst_94 : f32 to vector<8x32xf32>
    %164 = arith.maximumf %162, %163 : vector<8x32xf32>
    %c1_95 = arith.constant 1 : index
    %c0_96 = arith.constant 0 : index
    %c0_97 = arith.constant 0 : index
    %165 = vector.load %arg10[%c1_95, %c0_96, %c0_97] : memref<4x32x32xf32, #tpu.memory_space<vmem>>, vector<1x32x32xf32>
    %166 = vector.shape_cast %165 : vector<1x32x32xf32> to vector<32x32xf32>
    %cst_98 = arith.constant dense<0.000000e+00> : vector<8x32xf32>
    %167 = tpu.matmul %164, %166, %cst_98 {dimension_numbers = #tpu.dot_dimension_numbers<[1], [0], [0], [1], [0, 0, 1, 1], [], []>} : vector<8x32xf32>, vector<32x32xf32>, vector<8x32xf32> -> vector<8x32xf32>
    %c1_99 = arith.constant 1 : index
    %c0_100 = arith.constant 0 : index
    %c0_101 = arith.constant 0 : index
    %168 = vector.load %arg11[%c1_99, %c0_100, %c0_101] : memref<4x1x32xf32, #tpu.memory_space<vmem>>, vector<1x1x32xf32>
    %169 = vector.shape_cast %168 : vector<1x1x32xf32> to vector<1x32xf32>
    %170 = vector.broadcast %169 : vector<1x32xf32> to vector<8x32xf32>
    %171 = arith.addf %167, %170 : vector<8x32xf32>
    %172 = arith.addf %171, %155 : vector<8x32xf32>
    %173 = vector.broadcast %3 : vector<8x1xf32> to vector<8x32xf32>
    %174 = arith.mulf %172, %173 : vector<8x32xf32>
    %c4_102 = arith.constant 4 : index
    %c0_103 = arith.constant 0 : index
    %c0_104 = arith.constant 0 : index
    %175 = vector.load %arg5[%c4_102, %c0_103, %c0_104] : memref<10x1x32xf32, #tpu.memory_space<vmem>>, vector<1x1x32xf32>
    %176 = vector.shape_cast %175 : vector<1x1x32xf32> to vector<1x32xf32>
    %c5_105 = arith.constant 5 : index
    %c0_106 = arith.constant 0 : index
    %c0_107 = arith.constant 0 : index
    %177 = vector.load %arg5[%c5_105, %c0_106, %c0_107] : memref<10x1x32xf32, #tpu.memory_space<vmem>>, vector<1x1x32xf32>
    %178 = vector.shape_cast %177 : vector<1x1x32xf32> to vector<1x32xf32>
    %c6 = arith.constant 6 : index
    %c0_108 = arith.constant 0 : index
    %c0_109 = arith.constant 0 : index
    %179 = vector.load %arg5[%c6, %c0_108, %c0_109] : memref<10x1x32xf32, #tpu.memory_space<vmem>>, vector<1x1x32xf32>
    %180 = vector.shape_cast %179 : vector<1x1x32xf32> to vector<1x32xf32>
    %c7 = arith.constant 7 : index
    %c0_110 = arith.constant 0 : index
    %c0_111 = arith.constant 0 : index
    %181 = vector.load %arg5[%c7, %c0_110, %c0_111] : memref<10x1x32xf32, #tpu.memory_space<vmem>>, vector<1x1x32xf32>
    %182 = vector.shape_cast %181 : vector<1x1x32xf32> to vector<1x32xf32>
    %cst_112 = arith.constant dense<0.000000e+00> : vector<8xf32>
    %183 = vector.multi_reduction <add>, %174, %cst_112 [1] : vector<8x32xf32> to vector<8xf32>
    %184 = vector.shape_cast %183 : vector<8xf32> to vector<8x1xf32>
    %cst_113 = arith.constant 3.200000e+01 : f32
    %185 = vector.broadcast %cst_113 : f32 to vector<8x1xf32>
    %186 = arith.divf %184, %185 : vector<8x1xf32>
    %187 = vector.broadcast %186 : vector<8x1xf32> to vector<8x32xf32>
    %188 = arith.subf %174, %187 : vector<8x32xf32>
    %189 = arith.mulf %188, %188 : vector<8x32xf32>
    %cst_114 = arith.constant dense<0.000000e+00> : vector<8xf32>
    %190 = vector.multi_reduction <add>, %189, %cst_114 [1] : vector<8x32xf32> to vector<8xf32>
    %191 = vector.shape_cast %190 : vector<8xf32> to vector<8x1xf32>
    %cst_115 = arith.constant 3.200000e+01 : f32
    %192 = vector.broadcast %cst_115 : f32 to vector<8x1xf32>
    %193 = arith.divf %191, %192 : vector<8x1xf32>
    %194 = vector.broadcast %186 : vector<8x1xf32> to vector<8x32xf32>
    %195 = arith.subf %174, %194 : vector<8x32xf32>
    %cst_116 = arith.constant 9.99999993E-9 : f32
    %196 = vector.broadcast %cst_116 : f32 to vector<8x1xf32>
    %197 = arith.addf %193, %196 : vector<8x1xf32>
    %198 = math.rsqrt %197 : vector<8x1xf32>
    %199 = vector.broadcast %198 : vector<8x1xf32> to vector<8x32xf32>
    %200 = arith.mulf %195, %199 : vector<8x32xf32>
    %201 = vector.broadcast %176 : vector<1x32xf32> to vector<8x32xf32>
    %202 = arith.mulf %200, %201 : vector<8x32xf32>
    %203 = vector.broadcast %178 : vector<1x32xf32> to vector<8x32xf32>
    %204 = arith.addf %202, %203 : vector<8x32xf32>
    %cst_117 = arith.constant 0.000000e+00 : f32
    %205 = vector.broadcast %cst_117 : f32 to vector<8x32xf32>
    %c6_118 = arith.constant 6 : index
    %c0_119 = arith.constant 0 : index
    %c0_120 = arith.constant 0 : index
    %206 = vector.load %arg6[%c6_118, %c0_119, %c0_120] : memref<12x32x16xf32, #tpu.memory_space<vmem>>, vector<1x32x16xf32>
    %207 = vector.shape_cast %206 : vector<1x32x16xf32> to vector<32x16xf32>
    %cst_121 = arith.constant dense<0.000000e+00> : vector<8x16xf32>
    %208 = tpu.matmul %204, %207, %cst_121 {dimension_numbers = #tpu.dot_dimension_numbers<[1], [0], [0], [1], [0, 0, 1, 1], [], []>} : vector<8x32xf32>, vector<32x16xf32>, vector<8x16xf32> -> vector<8x16xf32>
    %c6_122 = arith.constant 6 : index
    %c0_123 = arith.constant 0 : index
    %c0_124 = arith.constant 0 : index
    %209 = vector.load %arg7[%c6_122, %c0_123, %c0_124] : memref<12x1x16xf32, #tpu.memory_space<vmem>>, vector<1x1x16xf32>
    %210 = vector.shape_cast %209 : vector<1x1x16xf32> to vector<1x16xf32>
    %211 = vector.broadcast %210 : vector<1x16xf32> to vector<8x16xf32>
    %212 = arith.addf %208, %211 : vector<8x16xf32>
    %c8 = arith.constant 8 : index
    %c0_125 = arith.constant 0 : index
    %c0_126 = arith.constant 0 : index
    %213 = vector.load %arg6[%c8, %c0_125, %c0_126] : memref<12x32x16xf32, #tpu.memory_space<vmem>>, vector<1x32x16xf32>
    %214 = vector.shape_cast %213 : vector<1x32x16xf32> to vector<32x16xf32>
    %cst_127 = arith.constant dense<0.000000e+00> : vector<8x16xf32>
    %215 = tpu.matmul %174, %214, %cst_127 {dimension_numbers = #tpu.dot_dimension_numbers<[1], [0], [0], [1], [0, 0, 1, 1], [], []>} : vector<8x32xf32>, vector<32x16xf32>, vector<8x16xf32> -> vector<8x16xf32>
    %c8_128 = arith.constant 8 : index
    %c0_129 = arith.constant 0 : index
    %c0_130 = arith.constant 0 : index
    %216 = vector.load %arg7[%c8_128, %c0_129, %c0_130] : memref<12x1x16xf32, #tpu.memory_space<vmem>>, vector<1x1x16xf32>
    %217 = vector.shape_cast %216 : vector<1x1x16xf32> to vector<1x16xf32>
    %218 = vector.broadcast %217 : vector<1x16xf32> to vector<8x16xf32>
    %219 = arith.addf %215, %218 : vector<8x16xf32>
    %c10 = arith.constant 10 : index
    %c0_131 = arith.constant 0 : index
    %c0_132 = arith.constant 0 : index
    %220 = vector.load %arg6[%c10, %c0_131, %c0_132] : memref<12x32x16xf32, #tpu.memory_space<vmem>>, vector<1x32x16xf32>
    %221 = vector.shape_cast %220 : vector<1x32x16xf32> to vector<32x16xf32>
    %cst_133 = arith.constant dense<0.000000e+00> : vector<8x16xf32>
    %222 = tpu.matmul %174, %221, %cst_133 {dimension_numbers = #tpu.dot_dimension_numbers<[1], [0], [0], [1], [0, 0, 1, 1], [], []>} : vector<8x32xf32>, vector<32x16xf32>, vector<8x16xf32> -> vector<8x16xf32>
    %c10_134 = arith.constant 10 : index
    %c0_135 = arith.constant 0 : index
    %c0_136 = arith.constant 0 : index
    %223 = vector.load %arg7[%c10_134, %c0_135, %c0_136] : memref<12x1x16xf32, #tpu.memory_space<vmem>>, vector<1x1x16xf32>
    %224 = vector.shape_cast %223 : vector<1x1x16xf32> to vector<1x16xf32>
    %225 = vector.broadcast %224 : vector<1x16xf32> to vector<8x16xf32>
    %226 = arith.addf %222, %225 : vector<8x16xf32>
    %cst_137 = arith.constant 2.500000e-01 : f32
    %227 = vector.broadcast %cst_137 : f32 to vector<8x16xf32>
    %228 = arith.mulf %212, %227 : vector<8x16xf32>
    %229 = vector.shape_cast %228 : vector<8x16xf32> to vector<1x8x16xf32>
    %230 = vector.shape_cast %219 : vector<8x16xf32> to vector<1x8x16xf32>
    %231 = vector.shape_cast %226 : vector<8x16xf32> to vector<1x8x16xf32>
    "tpu.trace_start"() <{level = 10 : i32, message = "bqd,bkd->bqk"}> : () -> ()
    %cst_138 = arith.constant dense<0.000000e+00> : vector<1x8x8xf32>
    %232 = tpu.matmul %229, %230, %cst_138 {dimension_numbers = #tpu.dot_dimension_numbers<[2], [2], [1], [1], [0, 0, 0, 1, 1, 1], [0], [0]>} : vector<1x8x16xf32>, vector<1x8x16xf32>, vector<1x8x8xf32> -> vector<1x8x8xf32>
    "tpu.trace_stop"() : () -> ()
    %233 = vector.shape_cast %9 : vector<8x8xf32> to vector<1x8x8xf32>
    %234 = arith.addf %232, %233 : vector<1x8x8xf32>
    %cst_139 = arith.constant dense<0xFF800000> : vector<1x8xf32>
    %235 = vector.multi_reduction <maximumf>, %234, %cst_139 [2] : vector<1x8x8xf32> to vector<1x8xf32>
    %236 = vector.shape_cast %235 : vector<1x8xf32> to vector<1x8x1xf32>
    %237 = vector.broadcast %236 : vector<1x8x1xf32> to vector<1x8x8xf32>
    %238 = arith.subf %234, %237 : vector<1x8x8xf32>
    %239 = math.exp %238 : vector<1x8x8xf32>
    %cst_140 = arith.constant dense<0.000000e+00> : vector<1x8xf32>
    %240 = vector.multi_reduction <add>, %239, %cst_140 [2] : vector<1x8x8xf32> to vector<1x8xf32>
    %241 = vector.shape_cast %240 : vector<1x8xf32> to vector<1x8x1xf32>
    %242 = vector.broadcast %241 : vector<1x8x1xf32> to vector<1x8x8xf32>
    %243 = arith.divf %239, %242 : vector<1x8x8xf32>
    "tpu.trace_start"() <{level = 10 : i32, message = "bqk,bkd->bqd"}> : () -> ()
    %cst_141 = arith.constant dense<0.000000e+00> : vector<1x8x16xf32>
    %244 = tpu.matmul %243, %231, %cst_141 {dimension_numbers = #tpu.dot_dimension_numbers<[2], [1], [1], [2], [0, 0, 0, 1, 1, 2], [0], [0]>} : vector<1x8x8xf32>, vector<1x8x16xf32>, vector<1x8x16xf32> -> vector<1x8x16xf32>
    "tpu.trace_stop"() : () -> ()
    %245 = vector.shape_cast %244 : vector<1x8x16xf32> to vector<8x16xf32>
    %c2_142 = arith.constant 2 : index
    %c0_143 = arith.constant 0 : index
    %c0_144 = arith.constant 0 : index
    %246 = vector.load %arg8[%c2_142, %c0_143, %c0_144] : memref<4x16x32xf32, #tpu.memory_space<vmem>>, vector<1x16x32xf32>
    %247 = vector.shape_cast %246 : vector<1x16x32xf32> to vector<16x32xf32>
    %cst_145 = arith.constant dense<0.000000e+00> : vector<8x32xf32>
    %248 = tpu.matmul %245, %247, %cst_145 {dimension_numbers = #tpu.dot_dimension_numbers<[1], [0], [0], [1], [0, 0, 1, 1], [], []>} : vector<8x16xf32>, vector<16x32xf32>, vector<8x32xf32> -> vector<8x32xf32>
    %249 = arith.addf %205, %248 : vector<8x32xf32>
    %c7_146 = arith.constant 7 : index
    %c0_147 = arith.constant 0 : index
    %c0_148 = arith.constant 0 : index
    %250 = vector.load %arg6[%c7_146, %c0_147, %c0_148] : memref<12x32x16xf32, #tpu.memory_space<vmem>>, vector<1x32x16xf32>
    %251 = vector.shape_cast %250 : vector<1x32x16xf32> to vector<32x16xf32>
    %cst_149 = arith.constant dense<0.000000e+00> : vector<8x16xf32>
    %252 = tpu.matmul %204, %251, %cst_149 {dimension_numbers = #tpu.dot_dimension_numbers<[1], [0], [0], [1], [0, 0, 1, 1], [], []>} : vector<8x32xf32>, vector<32x16xf32>, vector<8x16xf32> -> vector<8x16xf32>
    %c7_150 = arith.constant 7 : index
    %c0_151 = arith.constant 0 : index
    %c0_152 = arith.constant 0 : index
    %253 = vector.load %arg7[%c7_150, %c0_151, %c0_152] : memref<12x1x16xf32, #tpu.memory_space<vmem>>, vector<1x1x16xf32>
    %254 = vector.shape_cast %253 : vector<1x1x16xf32> to vector<1x16xf32>
    %255 = vector.broadcast %254 : vector<1x16xf32> to vector<8x16xf32>
    %256 = arith.addf %252, %255 : vector<8x16xf32>
    %c9 = arith.constant 9 : index
    %c0_153 = arith.constant 0 : index
    %c0_154 = arith.constant 0 : index
    %257 = vector.load %arg6[%c9, %c0_153, %c0_154] : memref<12x32x16xf32, #tpu.memory_space<vmem>>, vector<1x32x16xf32>
    %258 = vector.shape_cast %257 : vector<1x32x16xf32> to vector<32x16xf32>
    %cst_155 = arith.constant dense<0.000000e+00> : vector<8x16xf32>
    %259 = tpu.matmul %174, %258, %cst_155 {dimension_numbers = #tpu.dot_dimension_numbers<[1], [0], [0], [1], [0, 0, 1, 1], [], []>} : vector<8x32xf32>, vector<32x16xf32>, vector<8x16xf32> -> vector<8x16xf32>
    %c9_156 = arith.constant 9 : index
    %c0_157 = arith.constant 0 : index
    %c0_158 = arith.constant 0 : index
    %260 = vector.load %arg7[%c9_156, %c0_157, %c0_158] : memref<12x1x16xf32, #tpu.memory_space<vmem>>, vector<1x1x16xf32>
    %261 = vector.shape_cast %260 : vector<1x1x16xf32> to vector<1x16xf32>
    %262 = vector.broadcast %261 : vector<1x16xf32> to vector<8x16xf32>
    %263 = arith.addf %259, %262 : vector<8x16xf32>
    %c11 = arith.constant 11 : index
    %c0_159 = arith.constant 0 : index
    %c0_160 = arith.constant 0 : index
    %264 = vector.load %arg6[%c11, %c0_159, %c0_160] : memref<12x32x16xf32, #tpu.memory_space<vmem>>, vector<1x32x16xf32>
    %265 = vector.shape_cast %264 : vector<1x32x16xf32> to vector<32x16xf32>
    %cst_161 = arith.constant dense<0.000000e+00> : vector<8x16xf32>
    %266 = tpu.matmul %174, %265, %cst_161 {dimension_numbers = #tpu.dot_dimension_numbers<[1], [0], [0], [1], [0, 0, 1, 1], [], []>} : vector<8x32xf32>, vector<32x16xf32>, vector<8x16xf32> -> vector<8x16xf32>
    %c11_162 = arith.constant 11 : index
    %c0_163 = arith.constant 0 : index
    %c0_164 = arith.constant 0 : index
    %267 = vector.load %arg7[%c11_162, %c0_163, %c0_164] : memref<12x1x16xf32, #tpu.memory_space<vmem>>, vector<1x1x16xf32>
    %268 = vector.shape_cast %267 : vector<1x1x16xf32> to vector<1x16xf32>
    %269 = vector.broadcast %268 : vector<1x16xf32> to vector<8x16xf32>
    %270 = arith.addf %266, %269 : vector<8x16xf32>
    %cst_165 = arith.constant 2.500000e-01 : f32
    %271 = vector.broadcast %cst_165 : f32 to vector<8x16xf32>
    %272 = arith.mulf %256, %271 : vector<8x16xf32>
    %273 = vector.shape_cast %272 : vector<8x16xf32> to vector<1x8x16xf32>
    %274 = vector.shape_cast %263 : vector<8x16xf32> to vector<1x8x16xf32>
    %275 = vector.shape_cast %270 : vector<8x16xf32> to vector<1x8x16xf32>
    "tpu.trace_start"() <{level = 10 : i32, message = "bqd,bkd->bqk"}> : () -> ()
    %cst_166 = arith.constant dense<0.000000e+00> : vector<1x8x8xf32>
    %276 = tpu.matmul %273, %274, %cst_166 {dimension_numbers = #tpu.dot_dimension_numbers<[2], [2], [1], [1], [0, 0, 0, 1, 1, 1], [0], [0]>} : vector<1x8x16xf32>, vector<1x8x16xf32>, vector<1x8x8xf32> -> vector<1x8x8xf32>
    "tpu.trace_stop"() : () -> ()
    %277 = vector.shape_cast %9 : vector<8x8xf32> to vector<1x8x8xf32>
    %278 = arith.addf %276, %277 : vector<1x8x8xf32>
    %cst_167 = arith.constant dense<0xFF800000> : vector<1x8xf32>
    %279 = vector.multi_reduction <maximumf>, %278, %cst_167 [2] : vector<1x8x8xf32> to vector<1x8xf32>
    %280 = vector.shape_cast %279 : vector<1x8xf32> to vector<1x8x1xf32>
    %281 = vector.broadcast %280 : vector<1x8x1xf32> to vector<1x8x8xf32>
    %282 = arith.subf %278, %281 : vector<1x8x8xf32>
    %283 = math.exp %282 : vector<1x8x8xf32>
    %cst_168 = arith.constant dense<0.000000e+00> : vector<1x8xf32>
    %284 = vector.multi_reduction <add>, %283, %cst_168 [2] : vector<1x8x8xf32> to vector<1x8xf32>
    %285 = vector.shape_cast %284 : vector<1x8xf32> to vector<1x8x1xf32>
    %286 = vector.broadcast %285 : vector<1x8x1xf32> to vector<1x8x8xf32>
    %287 = arith.divf %283, %286 : vector<1x8x8xf32>
    "tpu.trace_start"() <{level = 10 : i32, message = "bqk,bkd->bqd"}> : () -> ()
    %cst_169 = arith.constant dense<0.000000e+00> : vector<1x8x16xf32>
    %288 = tpu.matmul %287, %275, %cst_169 {dimension_numbers = #tpu.dot_dimension_numbers<[2], [1], [1], [2], [0, 0, 0, 1, 1, 2], [0], [0]>} : vector<1x8x8xf32>, vector<1x8x16xf32>, vector<1x8x16xf32> -> vector<1x8x16xf32>
    "tpu.trace_stop"() : () -> ()
    %289 = vector.shape_cast %288 : vector<1x8x16xf32> to vector<8x16xf32>
    %c3_170 = arith.constant 3 : index
    %c0_171 = arith.constant 0 : index
    %c0_172 = arith.constant 0 : index
    %290 = vector.load %arg8[%c3_170, %c0_171, %c0_172] : memref<4x16x32xf32, #tpu.memory_space<vmem>>, vector<1x16x32xf32>
    %291 = vector.shape_cast %290 : vector<1x16x32xf32> to vector<16x32xf32>
    %cst_173 = arith.constant dense<0.000000e+00> : vector<8x32xf32>
    %292 = tpu.matmul %289, %291, %cst_173 {dimension_numbers = #tpu.dot_dimension_numbers<[1], [0], [0], [1], [0, 0, 1, 1], [], []>} : vector<8x16xf32>, vector<16x32xf32>, vector<8x32xf32> -> vector<8x32xf32>
    %293 = arith.addf %249, %292 : vector<8x32xf32>
    %c1_174 = arith.constant 1 : index
    %c0_175 = arith.constant 0 : index
    %c0_176 = arith.constant 0 : index
    %294 = vector.load %arg9[%c1_174, %c0_175, %c0_176] : memref<2x1x32xf32, #tpu.memory_space<vmem>>, vector<1x1x32xf32>
    %295 = vector.shape_cast %294 : vector<1x1x32xf32> to vector<1x32xf32>
    %296 = vector.broadcast %295 : vector<1x32xf32> to vector<8x32xf32>
    %297 = arith.addf %293, %296 : vector<8x32xf32>
    %298 = arith.addf %204, %297 : vector<8x32xf32>
    %cst_177 = arith.constant dense<0.000000e+00> : vector<8xf32>
    %299 = vector.multi_reduction <add>, %298, %cst_177 [1] : vector<8x32xf32> to vector<8xf32>
    %300 = vector.shape_cast %299 : vector<8xf32> to vector<8x1xf32>
    %cst_178 = arith.constant 3.200000e+01 : f32
    %301 = vector.broadcast %cst_178 : f32 to vector<8x1xf32>
    %302 = arith.divf %300, %301 : vector<8x1xf32>
    %303 = vector.broadcast %302 : vector<8x1xf32> to vector<8x32xf32>
    %304 = arith.subf %298, %303 : vector<8x32xf32>
    %305 = arith.mulf %304, %304 : vector<8x32xf32>
    %cst_179 = arith.constant dense<0.000000e+00> : vector<8xf32>
    %306 = vector.multi_reduction <add>, %305, %cst_179 [1] : vector<8x32xf32> to vector<8xf32>
    %307 = vector.shape_cast %306 : vector<8xf32> to vector<8x1xf32>
    %cst_180 = arith.constant 3.200000e+01 : f32
    %308 = vector.broadcast %cst_180 : f32 to vector<8x1xf32>
    %309 = arith.divf %307, %308 : vector<8x1xf32>
    %310 = vector.broadcast %302 : vector<8x1xf32> to vector<8x32xf32>
    %311 = arith.subf %298, %310 : vector<8x32xf32>
    %cst_181 = arith.constant 9.99999993E-9 : f32
    %312 = vector.broadcast %cst_181 : f32 to vector<8x1xf32>
    %313 = arith.addf %309, %312 : vector<8x1xf32>
    %314 = math.rsqrt %313 : vector<8x1xf32>
    %315 = vector.broadcast %314 : vector<8x1xf32> to vector<8x32xf32>
    %316 = arith.mulf %311, %315 : vector<8x32xf32>
    %317 = vector.broadcast %180 : vector<1x32xf32> to vector<8x32xf32>
    %318 = arith.mulf %316, %317 : vector<8x32xf32>
    %319 = vector.broadcast %182 : vector<1x32xf32> to vector<8x32xf32>
    %320 = arith.addf %318, %319 : vector<8x32xf32>
    %c2_182 = arith.constant 2 : index
    %c0_183 = arith.constant 0 : index
    %c0_184 = arith.constant 0 : index
    %321 = vector.load %arg10[%c2_182, %c0_183, %c0_184] : memref<4x32x32xf32, #tpu.memory_space<vmem>>, vector<1x32x32xf32>
    %322 = vector.shape_cast %321 : vector<1x32x32xf32> to vector<32x32xf32>
    %cst_185 = arith.constant dense<0.000000e+00> : vector<8x32xf32>
    %323 = tpu.matmul %320, %322, %cst_185 {dimension_numbers = #tpu.dot_dimension_numbers<[1], [0], [0], [1], [0, 0, 1, 1], [], []>} : vector<8x32xf32>, vector<32x32xf32>, vector<8x32xf32> -> vector<8x32xf32>
    %c2_186 = arith.constant 2 : index
    %c0_187 = arith.constant 0 : index
    %c0_188 = arith.constant 0 : index
    %324 = vector.load %arg11[%c2_186, %c0_187, %c0_188] : memref<4x1x32xf32, #tpu.memory_space<vmem>>, vector<1x1x32xf32>
    %325 = vector.shape_cast %324 : vector<1x1x32xf32> to vector<1x32xf32>
    %326 = vector.broadcast %325 : vector<1x32xf32> to vector<8x32xf32>
    %327 = arith.addf %323, %326 : vector<8x32xf32>
    %cst_189 = arith.constant 0.000000e+00 : f32
    %328 = vector.broadcast %cst_189 : f32 to vector<8x32xf32>
    %329 = arith.maximumf %327, %328 : vector<8x32xf32>
    %c3_190 = arith.constant 3 : index
    %c0_191 = arith.constant 0 : index
    %c0_192 = arith.constant 0 : index
    %330 = vector.load %arg10[%c3_190, %c0_191, %c0_192] : memref<4x32x32xf32, #tpu.memory_space<vmem>>, vector<1x32x32xf32>
    %331 = vector.shape_cast %330 : vector<1x32x32xf32> to vector<32x32xf32>
    %cst_193 = arith.constant dense<0.000000e+00> : vector<8x32xf32>
    %332 = tpu.matmul %329, %331, %cst_193 {dimension_numbers = #tpu.dot_dimension_numbers<[1], [0], [0], [1], [0, 0, 1, 1], [], []>} : vector<8x32xf32>, vector<32x32xf32>, vector<8x32xf32> -> vector<8x32xf32>
    %c3_194 = arith.constant 3 : index
    %c0_195 = arith.constant 0 : index
    %c0_196 = arith.constant 0 : index
    %333 = vector.load %arg11[%c3_194, %c0_195, %c0_196] : memref<4x1x32xf32, #tpu.memory_space<vmem>>, vector<1x1x32xf32>
    %334 = vector.shape_cast %333 : vector<1x1x32xf32> to vector<1x32xf32>
    %335 = vector.broadcast %334 : vector<1x32xf32> to vector<8x32xf32>
    %336 = arith.addf %332, %335 : vector<8x32xf32>
    %337 = arith.addf %336, %320 : vector<8x32xf32>
    %338 = vector.broadcast %3 : vector<8x1xf32> to vector<8x32xf32>
    %339 = arith.mulf %337, %338 : vector<8x32xf32>
    %c8_197 = arith.constant 8 : index
    %c0_198 = arith.constant 0 : index
    %c0_199 = arith.constant 0 : index
    %340 = vector.load %arg5[%c8_197, %c0_198, %c0_199] : memref<10x1x32xf32, #tpu.memory_space<vmem>>, vector<1x1x32xf32>
    %341 = vector.shape_cast %340 : vector<1x1x32xf32> to vector<1x32xf32>
    %c9_200 = arith.constant 9 : index
    %c0_201 = arith.constant 0 : index
    %c0_202 = arith.constant 0 : index
    %342 = vector.load %arg5[%c9_200, %c0_201, %c0_202] : memref<10x1x32xf32, #tpu.memory_space<vmem>>, vector<1x1x32xf32>
    %343 = vector.shape_cast %342 : vector<1x1x32xf32> to vector<1x32xf32>
    %cst_203 = arith.constant dense<0.000000e+00> : vector<8xf32>
    %344 = vector.multi_reduction <add>, %339, %cst_203 [1] : vector<8x32xf32> to vector<8xf32>
    %345 = vector.shape_cast %344 : vector<8xf32> to vector<8x1xf32>
    %cst_204 = arith.constant 3.200000e+01 : f32
    %346 = vector.broadcast %cst_204 : f32 to vector<8x1xf32>
    %347 = arith.divf %345, %346 : vector<8x1xf32>
    %348 = vector.broadcast %347 : vector<8x1xf32> to vector<8x32xf32>
    %349 = arith.subf %339, %348 : vector<8x32xf32>
    %350 = arith.mulf %349, %349 : vector<8x32xf32>
    %cst_205 = arith.constant dense<0.000000e+00> : vector<8xf32>
    %351 = vector.multi_reduction <add>, %350, %cst_205 [1] : vector<8x32xf32> to vector<8xf32>
    %352 = vector.shape_cast %351 : vector<8xf32> to vector<8x1xf32>
    %cst_206 = arith.constant 3.200000e+01 : f32
    %353 = vector.broadcast %cst_206 : f32 to vector<8x1xf32>
    %354 = arith.divf %352, %353 : vector<8x1xf32>
    %355 = vector.broadcast %347 : vector<8x1xf32> to vector<8x32xf32>
    %356 = arith.subf %339, %355 : vector<8x32xf32>
    %cst_207 = arith.constant 9.99999993E-9 : f32
    %357 = vector.broadcast %cst_207 : f32 to vector<8x1xf32>
    %358 = arith.addf %354, %357 : vector<8x1xf32>
    %359 = math.rsqrt %358 : vector<8x1xf32>
    %360 = vector.broadcast %359 : vector<8x1xf32> to vector<8x32xf32>
    %361 = arith.mulf %356, %360 : vector<8x32xf32>
    %362 = vector.broadcast %341 : vector<1x32xf32> to vector<8x32xf32>
    %363 = arith.mulf %361, %362 : vector<8x32xf32>
    %364 = vector.broadcast %343 : vector<1x32xf32> to vector<8x32xf32>
    %365 = arith.addf %363, %364 : vector<8x32xf32>
    %366 = vector.shape_cast %365 : vector<8x32xf32> to vector<1x8x32xf32>
    %c0_208 = arith.constant 0 : index
    %c0_209 = arith.constant 0 : index
    %c0_210 = arith.constant 0 : index
    %367 = vector.load %arg3[%c0_208, %c0_209, %c0_210] : memref<1x8x32xf32, #tpu.memory_space<vmem>>, vector<1x8x32xf32>
    %368 = arith.mulf %366, %367 : vector<1x8x32xf32>
    %cst_211 = arith.constant dense<0.000000e+00> : vector<1x8xf32>
    %369 = vector.multi_reduction <add>, %368, %cst_211 [2] : vector<1x8x32xf32> to vector<1x8xf32>
    %c0_212 = arith.constant 0 : index
    %c0_213 = arith.constant 0 : index
    %c0_214 = arith.constant 0 : index
    %370 = vector.load %arg4[%c0_212, %c0_213, %c0_214] : memref<1x8x32xf32, #tpu.memory_space<vmem>>, vector<1x8x32xf32>
    %371 = arith.mulf %366, %370 : vector<1x8x32xf32>
    %cst_215 = arith.constant dense<0.000000e+00> : vector<1x8xf32>
    %372 = vector.multi_reduction <add>, %371, %cst_215 [2] : vector<1x8x32xf32> to vector<1x8xf32>
    %373 = vector.shape_cast %369 : vector<1x8xf32> to vector<1x1x8xf32>
    %374 = vector.shape_cast %372 : vector<1x8xf32> to vector<1x1x8xf32>
    %375 = tpu.concatenate %373, %374 in 1 : vector<1x1x8xf32>, vector<1x1x8xf32> -> vector<1x2x8xf32>
    %c0_216 = arith.constant 0 : index
    %c0_217 = arith.constant 0 : index
    %c0_218 = arith.constant 0 : index
    %376 = vector.load %arg12[%c0_216, %c0_217, %c0_218] : memref<1x2x8xf32, #tpu.memory_space<vmem>>, vector<1x2x8xf32>
    tpu.vector_store %arg12[%c0_216, %c0_217, %c0_218], %375 {strides = array<i32>} : memref<1x2x8xf32, #tpu.memory_space<vmem>>, vector<1x2x8xf32>,
    return
  }
  func.func @transform_0(%arg0: i32) -> (i32, i32, i32) {
    %c0_i32 = arith.constant 0 : i32
    %c0_i32_0 = arith.constant 0 : i32
    %c0_i32_1 = arith.constant 0 : i32
    return %arg0, %c0_i32, %c0_i32_0 : i32, i32, i32
  }
  func.func @transform_1(%arg0: i32) -> (i32, i32, i32) {
    %c0_i32 = arith.constant 0 : i32
    %c0_i32_0 = arith.constant 0 : i32
    %c0_i32_1 = arith.constant 0 : i32
    return %arg0, %c0_i32, %c0_i32_0 : i32, i32, i32
  }
  func.func @transform_2(%arg0: i32) -> (i32, i32, i32) {
    %c0_i32 = arith.constant 0 : i32
    %c0_i32_0 = arith.constant 0 : i32
    %c0_i32_1 = arith.constant 0 : i32
    return %arg0, %c0_i32, %c0_i32_0 : i32, i32, i32
  }
  func.func @transform_3(%arg0: i32) -> (i32, i32, i32) {
    %c0_i32 = arith.constant 0 : i32
    %c0_i32_0 = arith.constant 0 : i32
    %c0_i32_1 = arith.constant 0 : i32
    return %arg0, %c0_i32, %c0_i32_0 : i32, i32, i32
  }
  func.func @transform_4(%arg0: i32) -> (i32, i32, i32) {
    %c0_i32 = arith.constant 0 : i32
    %c0_i32_0 = arith.constant 0 : i32
    %c0_i32_1 = arith.constant 0 : i32
    %c0_i32_2 = arith.constant 0 : i32
    return %c0_i32, %c0_i32_0, %c0_i32_1 : i32, i32, i32
  }
  func.func @transform_5(%arg0: i32) -> (i32, i32, i32) {
    %c0_i32 = arith.constant 0 : i32
    %c0_i32_0 = arith.constant 0 : i32
    %c0_i32_1 = arith.constant 0 : i32
    %c0_i32_2 = arith.constant 0 : i32
    return %c0_i32, %c0_i32_0, %c0_i32_1 : i32, i32, i32
  }
  func.func @transform_6(%arg0: i32) -> (i32, i32, i32) {
    %c0_i32 = arith.constant 0 : i32
    %c0_i32_0 = arith.constant 0 : i32
    %c0_i32_1 = arith.constant 0 : i32
    %c0_i32_2 = arith.constant 0 : i32
    return %c0_i32, %c0_i32_0, %c0_i32_1 : i32, i32, i32
  }
  func.func @transform_7(%arg0: i32) -> (i32, i32, i32) {
    %c0_i32 = arith.constant 0 : i32
    %c0_i32_0 = arith.constant 0 : i32
    %c0_i32_1 = arith.constant 0 : i32
    %c0_i32_2 = arith.constant 0 : i32
    return %c0_i32, %c0_i32_0, %c0_i32_1 : i32, i32, i32
  }
  func.func @transform_8(%arg0: i32) -> (i32, i32, i32) {
    %c0_i32 = arith.constant 0 : i32
    %c0_i32_0 = arith.constant 0 : i32
    %c0_i32_1 = arith.constant 0 : i32
    %c0_i32_2 = arith.constant 0 : i32
    return %c0_i32, %c0_i32_0, %c0_i32_1 : i32, i32, i32
  }
  func.func @transform_9(%arg0: i32) -> (i32, i32, i32) {
    %c0_i32 = arith.constant 0 : i32
    %c0_i32_0 = arith.constant 0 : i32
    %c0_i32_1 = arith.constant 0 : i32
    %c0_i32_2 = arith.constant 0 : i32
    return %c0_i32, %c0_i32_0, %c0_i32_1 : i32, i32, i32
  }
  func.func @transform_10(%arg0: i32) -> (i32, i32, i32) {
    %c0_i32 = arith.constant 0 : i32
    %c0_i32_0 = arith.constant 0 : i32
    %c0_i32_1 = arith.constant 0 : i32
    %c0_i32_2 = arith.constant 0 : i32
    return %c0_i32, %c0_i32_0, %c0_i32_1 : i32, i32, i32
  }
  func.func @transform_11(%arg0: i32) -> (i32, i32, i32) {
    %c0_i32 = arith.constant 0 : i32
    %c0_i32_0 = arith.constant 0 : i32
    %c0_i32_1 = arith.constant 0 : i32
    return %arg0, %c0_i32, %c0_i32_0 : i32, i32, i32
  }
}

</mosaic_0001>

<bundles_post_ra>
// kernel: tpu_custom_call.1
= control target key start
LH: loop header
LB: loop body
LE: loop exit
PB: predicated region body
PF: predicated region fallthrough
CT: control target
= control target key end

     0   :  { %s2537_s0 = inlined_call_operand.vmem [shape: f32[2,8,32], index: 0, kind: input, shape index: {}]   ;;  %s2538_s1 = inlined_call_operand.vmem [shape: f32[2,8,1], index: 1, kind: input, shape index: {}]   ;;  %s2539_s2 = inlined_call_operand.vmem [shape: f32[2,8,32], index: 2, kind: input, shape index: {}]   ;;  %s2540_s3 = inlined_call_operand.vmem [shape: f32[2,8,32], index: 3, kind: input, shape index: {}]   ;;  %s2541_s4 = inlined_call_operand.vmem [shape: f32[10,1,32], index: 4, kind: input, shape index: {}]   ;;  %s2542_s5 = inlined_call_operand.vmem [shape: f32[12,32,16], index: 5, kind: input, shape index: {}]   ;;  %s2543_s6 = inlined_call_operand.vmem [shape: f32[12,1,16], index: 6, kind: input, shape index: {}]   ;;  %s2544_s7 = inlined_call_operand.vmem [shape: f32[4,16,32], index: 7, kind: input, shape index: {}]   ;;  %s2545_s8 = inlined_call_operand.vmem [shape: f32[2,1,32], index: 8, kind: input, shape index: {}]   ;;  %s2546_s9 = inlined_call_operand.vmem [shape: f32[4,32,32], index: 9, kind: input, shape index: {}]   ;;  %s2547_s10 = inlined_call_operand.vmem [shape: f32[4,1,32], index: 10, kind: input, shape index: {}]   ;;  %s2548_s11 = inlined_call_operand.hbm [shape: f32[2,2,8], index: 11, kind: output, shape index: {}]  }
   0x1   :  { %2549 = sst [smem:[#allocation5_spill]] %s2537_s0 }
   0x2   :  { %16 = vsyncpa [#allocation3], 0 }
   0x3   :  { %18 = vsyncpa [#allocation3 + $0x1], 0  ;;  %s2032_s17 = smov 0   ;;  %s2034_s18 = smov 0  }
   0x4   :  { %s2036_s19 = smov 0   ;;  %s2038_s20 = smov 0  }
   0x5 LB: > { %s2053_s21 = sadd.s32 4294967295, %s1967_s20   ;;  %s1674_s22 = sadd.s32 4294967294, %s1967_s20   ;;  %s1967_s20 = sphi %s2038_s20, %s2556_s20   ;;  %s1963_s19 = sphi %s2036_s19, %s2555_s19   ;;  %s1959_s18 = sphi %s2034_s18, %s2554_s18   ;;  %s1955_s17 = sphi %s2032_s17, %s2553_s17  }
   0x6   : > { %s2057_s23 = sadd.s32 1, %s1967_s20   ;;  %s282_s24 = sadd.s32 1, %s1963_s19 }
   0x7   : > { %s279_s25 = ssub.s32 %s1967_s20, %s2057_s23  ;;  %p292_p0 = scmp.ne.s32.totalorder %s1963_s19, %s1959_s18 }
   0x8   : > { %p280_p1 = scmp.eq.s32.totalorder %s279_s25, 0  ;;  %p293_p2 = scmp.eq.s32.totalorder %s2053_s21, 1 }
   0x9   : > { %p298_p3 = scmp.ne.s32.totalorder %s1959_s18, %s1955_s17  ;;  %p299_p4 = scmp.eq.s32.totalorder %s1674_s22, 1 }
   0xa   : > { %s2068_s26 = scalar_select %p280_p1, %s1963_s19, %s282_s24  }
   0xb   : > { %p2070_p5 = por %p293_p2, %p292_p0  ;;  %p2074_p6 = por %p299_p4, %p298_p3 }
   0xc   : > { %p1677_p7 = scmp.ge.s32.totalorder %s1967_s20, 1  ;;  %p366_p8 = scmp.lt.s32.totalorder %s1967_s20, 3 }
   0xe   : > { %p367_p9 = pnand %p1677_p7, %p366_p8 }
   0xf   : > { %p417_p10 = scmp.lt.s32.totalorder (!%p367_p9), %s2053_s21, 1  ;;  %s2552_s0 = sld [smem:[#allocation5_spill]] (!%p367_p9) }
  0x10   : > { %370 = sbr.rel (%p367_p9) target bundleno = 4411 (0x113b), region = 64  ;;  %s1802_s16 = sshll.u32 (!%p367_p9), %s2053_s21, 1 }
  0x11   : > { %s1925_s22 = scalar_lea.hbm (!%p367_p9), %s2548_s11, 4 }
  0x15   : > { %s418_s29 = scalar_select %p417_p10, %s2053_s21, 1  ;;  %vm448_vm0 = vcmask 261120   ;;  %v1969_v2 = vmov 32.0   ;;  %v1690_v14 = vld [vmem:[%s2542_s5 + $0x58] sm:$0xff]  ;;  %v1689_v16 = vld [vmem:[%s2542_s5 + $0x50] sm:$0xff]  ;;  %v1688_v18 = vld [vmem:[%s2542_s5 + $0x48] sm:$0xff]  ;;  %v435_v49 = vlaneseq }
  0x16   : > { %1877 = vrcp.f32 %v1969_v2  ;;  %542 = vmatpush.msra.mxu1 %v1690_v14  ;;  %v489_v15 = vld [vmem:[%s2542_s5 + $0x18] sm:$0xff]  ;;  %v488_v17 = vld [vmem:[%s2542_s5 + $0x10] sm:$0xff]  ;;  %v487_v19 = vld [vmem:[%s2542_s5 + $0x8] sm:$0xff]  ;;  %vm581_vm5 = vcmask 130048   ;;  %v1970_v52 = vmov -1e+30  }
  0x17   : > { %s2082_s30 = sshll.u32 %s418_s29, 3  ;;  %509 = vmatpush.msra.mxu0 %v489_v15  ;;  %v1687_v20 = vld [vmem:[%s2542_s5 + $0x40] sm:$0xff]  ;;  %v1705_v22 = vld [vmem:[%s2542_s5 + $0x38] sm:$0xff]  ;;  %v1704_v23 = vld [vmem:[%s2542_s5 + $0x30] sm:$0xff]  ;;  %v436_v50 = vshrl.u32 %v435_v49, 7  ;;  %v2159_v51 = vand.u32 127, %v435_v49  ;;  %s1574_s29 = scalar_lea.hbm %s2548_s11, %s1802_s16 }
  0x18   : > { %s420_s14 = scalar_lea.vmem %s2552_s0, %s2082_s30  ;;  %543 = vmatpush.msra.mxu1 %v1689_v16  ;;  %v486_v21 = vld [vmem:[%s2542_s5] sm:$0xff]  ;;  %v1703_v24 = vld [vmem:[%s2542_s5 + $0x28] sm:$0xff]  ;;  %v1696_v48 = vld [vmem:[%s2542_s5 + $0x98] sm:$0xff]  ;;  %vm608_vm7 = vcmask 64512   ;;  %s424_s25 = scalar_lea.vmem %s2538_s1, %s2082_s30 }
  0x19   : > { %v2088_v0 = vld [vmem:[%s420_s14] sm:$0xff]  ;;  %510 = vmatpush.msra.mxu0 %v488_v17  ;;  %572 = vmatpush.msra.mxu2 %v1696_v48  ;;  %vm439_vm6 = vcmp.ge.s32.totalorder %v436_v50, %v2159_v51  ;;  %v1695_v57 = vld [vmem:[%s2542_s5 + $0x90] sm:$0xff]  ;;  %v1694_v58 = vld [vmem:[%s2542_s5 + $0x88] sm:$0xff]  ;;  %s432_s24 = scalar_lea.vmem %s2540_s3, %s2082_s30  ;;  %s428_s13 = scalar_lea.vmem %s2539_s2, %s2082_s30 }
  0x1a   : > { %v449_v1 = vsel %vm448_vm0, %v2088_v0, 0.0  ;;  %544 = vmatpush.msra.mxu1 %v1688_v18  ;;  %v1702_v27 = vld [vmem:[%s2542_s5 + $0x20] sm:$0xff]  ;;  %v2162_v53 = vsel %vm439_vm6, 0.0, %v1970_v52  ;;  %v1711_v59 = vld [vmem:[%s2542_s5 + $0x78] sm:$0xff]  ;;  %v1710_v61 = vld [vmem:[%s2542_s5 + $0x70] sm:$0xff]  ;;  %s414_s14 = sand.u32 1, %s1959_s18  }
  0x1b   : > { %450 = vadd.xlane.f32.xlu0 %v449_v1  ;;  %511 = vmatpush.msra.mxu0 %v487_v19  ;;  %v1849_v35 = vld [vmem:[%s2541_s4] ss:$0 sm:$0xff]  ;;  %v1850_v38 = vld [vmem:[%s2541_s4 + $0x1] ss:$0 sm:$0xff]  ;;  %v1851_v41 = vld [vmem:[%s2543_s6 + $0x2] ss:$0 sm:$0xff] }
  0x1c   : > { %v1878_v3 = vpop.eup %1877  ;;  %545 = vmatpush.msra.mxu1 %v1687_v20  ;;  %v1852_v44 = vld [vmem:[%s2543_s6] ss:$0 sm:$0xff]  ;;  %573 = vmatpush.msra.mxu2 %v1695_v57  ;;  %v1709_v62 = vld [vmem:[%s2542_s5 + $0x68] sm:$0xff]  ;;  %v1716_v14 = vld [vmem:[%s2542_s5 + $0xb0] sm:$0xff]  ;;  %s1678_s15 = sshll.u32 %s414_s14, 1  ;;  %s1564_s21 = scalar_lea.sflag [#allocation3], %s414_s14 }
  0x1d   : > { %v453_v4 = vmul.f32 32.0, %v1878_v3  ;;  %vm457_vm1 = vweird.f32 %v1878_v3  ;;  %512 = vmatpush.msra.mxu0 %v486_v21  ;;  %1692 = vmatmul.msk.f32.vlgmr.msra.gmra.mxu1 %vm448_vm0, %v2088_v0  ;;  %v1693_v60 = vld [vmem:[%s2542_s5 + $0x80] sm:$0xff]  ;;  %v1715_v15 = vld [vmem:[%s2542_s5 + $0xa8] sm:$0xff]  ;;  %v1723_v48 = vld [vmem:[%s2544_s7 + $0x10] sm:$0xff]  ;;  %s416_s30 = scalar_lea.vmem [#allocation2], %s1678_s15 }
  0x1e   : > { %710 = vmatpush.msrb.mxu1 %v1711_v59  ;;  %574 = vmatpush.msra.mxu2 %v1694_v58  ;;  %v1708_v63 = vld [vmem:[%s2542_s5 + $0x60] sm:$0xff]  ;;  %v657_v18 = vld [vmem:[%s2544_s7 + $0x8] sm:$0xff]  ;;  %s1576_s0 = sshll.u32 %s416_s30, 4  ;;  %s1577_s0 = int_to_ptr.vmem [resolvable:$true] %s1576_s0 }
  0x1f   : > { %v454_v5 = vsub.f32 1.0, %v453_v4  ;;  %680 = vmatpush.msrb.mxu0 %v1705_v22  ;;  %v1714_v17 = vld [vmem:[%s2542_s5 + $0xa0] sm:$0xff] }
  0x20   : > { %575 = vmatpush.msra.mxu2 %v1693_v60  ;;  %711 = vmatpush.msrb.mxu1 %v1710_v61 }
  0x21   : > { %v455_v6 = vmul.f32 %v1878_v3, %v454_v5  ;;  %681 = vmatpush.msrb.mxu0 %v1704_v23  ;;  %1698 = vmatmul.msk.f32.vlgmr.msra.gmra.mxu2 %vm448_vm0, %v2088_v0 }
  0x22   : > { %712 = vmatpush.msrb.mxu1 %v1709_v62 }
  0x23   : > { %v456_v7 = vadd.f32 %v1878_v3, %v455_v6  ;;  %682 = vmatpush.msrb.mxu0 %v1703_v24  ;;  %v1854_v6 = vld [vmem:[%s2543_s6 + $0x4] ss:$0 sm:$0xff] }
  0x24   : > { %713 = vmatpush.msrb.mxu1 %v1708_v63 }
  0x25   : > { %v2092_v8 = vsel %vm457_vm1, %v1878_v3, %v456_v7  ;;  %683 = vmatpush.msrb.mxu0 %v1702_v27  ;;  %1713 = vmatmul.msk.f32.vlgmr.msrb.gmra.mxu1 %vm448_vm0, %v2088_v0 }
  0x8e   : > { %v451_v9 = vpop.xlane.xlu0 %450 }
  0x8f   : > { %v459_v10 = vmul.f32 %v2092_v8, %v451_v9  ;;  %v1855_v9 = vld [vmem:[%s2543_s6 + $0x3] ss:$0 sm:$0xff] }
  0x91   : > { %v460_v11 = vsub.f32 %v2088_v0, %v459_v10 }
  0x93   : > { %v461_v12 = vmul.f32 %v460_v11, %v460_v11 }
  0x95   : > { %v462_v13 = vsel %vm448_vm0, %v461_v12, 0.0 }
  0x96   : > { %463 = vadd.xlane.f32.xlu0 %v462_v13  ;;  %v1717_v13 = vld [vmem:[%s2542_s5 + $0xb8] sm:$0xff] }
  0x97   : > { %740 = vmatpush.msrb.mxu2 %v1717_v13 }
  0x99   : > { %741 = vmatpush.msrb.mxu2 %v1716_v14  ;;  %v910_v14 = vld [vmem:[%s2546_s9 + $0x18] sm:$0xff] }
  0x9a   : > { %v547_v42 = vpop.f32.mrf.mxu1 }
  0x9b   : > { %v548_v43 = vadd.f32 %v1851_v41, %v547_v42  ;;  %742 = vmatpush.msrb.mxu2 %v1715_v15  ;;  %v908_v15 = vld [vmem:[%s2546_s9 + $0x8] sm:$0xff] }
  0x9d   : > { %1699 = vmatpush.xpose.msk.msra.mxu3 %vm581_vm5, %v548_v43  ;;  %743 = vmatpush.msrb.mxu2 %v1714_v17  ;;  %v1731_v17 = vld [vmem:[%s2546_s9 + $0x38] sm:$0xff] }
  0x9e   : > { %1719 = vmatmul.msk.f32.vlgmr.msrb.gmra.mxu2 %vm448_vm0, %v2088_v0 }
  0x9f   : > { %865 = vmatpush.msra.mxu2 %v657_v18  ;;  %v1730_v18 = vld [vmem:[%s2546_s9 + $0x30] sm:$0xff] }
  0xa4   : > { %v577_v7 = vpop.f32.mrf.mxu2 }
  0xa5   : > { %v578_v10 = vadd.f32 %v1854_v6, %v577_v7 }
  0xa7   : > { %651 = vmatpush.msrb.mxu3 %v578_v10 }
 0x109   : > { %v464_v25 = vpop.xlane.xlu0 %463 }
 0x10a   : > { %v465_v26 = vmul.f32 %v464_v25, %v2092_v8 }
 0x10c   : > { %v466_v28 = vadd.f32 1e-08, %v465_v26 }
 0x10e   : > { %1879 = vrsqrt.f32 %v466_v28  ;;  %vm473_vm3 = vweird.f32 %v466_v28 }
 0x114   : > { %v1880_v29 = vpop.eup %1879 }
 0x115   : > { %v468_v30 = vmul.f32 %v1880_v29, %v466_v28  ;;  %vm474_vm2 = vweird.f32 %v1880_v29 }
 0x116   : > { %vm475_vm4 = vmor %vm473_vm3, %vm474_vm2 }
 0x117   : > { %v469_v31 = vmul.f32 %v1880_v29, %v468_v30 }
 0x119   : > { %v470_v32 = vmul.f32 0.5, %v469_v31 }
 0x11b   : > { %v471_v33 = vsub.f32 1.5, %v470_v32 }
 0x11d   : > { %v472_v34 = vmul.f32 %v1880_v29, %v471_v33  ;;  %v656_v33 = vld [vmem:[%s2544_s7] sm:$0xff] }
 0x11e   : > { %866 = vmatpush.msra.mxu2 %v656_v33  ;;  %v1729_v33 = vld [vmem:[%s2546_s9 + $0x28] sm:$0xff] }
 0x11f   : > { %v476_v36 = vsel %vm475_vm4, %v1880_v29, %v472_v34  ;;  %v1853_v29 = vld [vmem:[%s2543_s6 + $0x1] ss:$0 sm:$0xff]  ;;  %v1856_v34 = vld [vmem:[%s2543_s6 + $0x5] ss:$0 sm:$0xff] }
 0x120   : > { %v477_v37 = vmul.f32 %v476_v36, %v460_v11  ;;  %v715_v11 = vpop.f32.mrf.mxu1 }
 0x121   : > { %v716_v12 = vadd.f32 %v1855_v9, %v715_v11 }
 0x122   : > { %v481_v39 = vmul.f32 %v1849_v35, %v477_v37  ;;  %v745_v35 = vpop.f32.mrf.mxu2 }
 0x123   : > { %v746_v36 = vadd.f32 %v1856_v34, %v745_v35  ;;  %v1728_v34 = vld [vmem:[%s2546_s9 + $0x20] sm:$0xff] }
 0x124   : > { %v2142_v40 = vadd.f32 %v1850_v38, %v481_v39  ;;  %v434_v35 = vld [vmem:[%s424_s25] sm:$0xff] }
 0x126   : > { %1686 = vmatmul.msk.f32.vlgmr.msra.gmra.mxu0 %vm448_vm0, %v2142_v40 }
 0x127   : > { %817 = vmatpush.msra.mxu0 %v746_v36  ;;  %v1971_v36 = vmov 0  }
 0x128   : > { %1847 = vset.pattern.permute.xlu2 %v1971_v36  ;;  %1848 = vset.pattern.permute.xlu0 %v1971_v36  ;;  %v1776_v36 = vld [vmem:[%s2542_s5 + $0x178] sm:$0xff] }
 0x12e   : > { %1707 = vmatmul.msk.f32.vlgmr.msrb.gmra.mxu0 %vm448_vm0, %v2142_v40 }
 0x12f   : > { %964 = vmatpush.msrb.mxu0 %v1731_v17  ;;  %v1762_v17 = vld [vmem:[%s2542_s5 + $0xe8] sm:$0xff] }
 0x131   : > { %965 = vmatpush.msrb.mxu0 %v1730_v18  ;;  %v1761_v18 = vld [vmem:[%s2542_s5 + $0xe0] sm:$0xff] }
 0x133   : > { %966 = vmatpush.msrb.mxu0 %v1729_v33 }
 0x135   : > { %967 = vmatpush.msrb.mxu0 %v1728_v34 }
 0x1a3   : > { %v514_v45 = vpop.f32.mrf.mxu0 }
 0x1a4   : > { %v515_v46 = vadd.f32 %v1852_v44, %v514_v45 }
 0x1a6   : > { %v580_v47 = vmul.f32 0.25, %v515_v46 }
 0x1a8   : > { %1700 = vmatmul.msk.f32.vlgmr.msra.gmra.mxu3 %vm581_vm5, %v580_v47  ;;  %v1724_v47 = vld [vmem:[%s2544_s7 + $0x18] sm:$0xff] }
 0x1a9   : > { %1720 = vmatpush.xpose.msk.msra.mxu3 %vm581_vm5, %v716_v12  ;;  %842 = vmatpush.msra.mxu1 %v1724_v47  ;;  %v1751_v47 = vld [vmem:[%s2542_s5 + $0x148] sm:$0xff] }
 0x1ab   : > { %v685_v30 = vpop.f32.mrf.mxu0  ;;  %843 = vmatpush.msra.mxu1 %v1723_v48  ;;  %v1744_v48 = vld [vmem:[%s2542_s5 + $0x100] sm:$0xff] }
 0x1ac   : > { %v686_v31 = vadd.f32 %v1853_v29, %v685_v30  ;;  %v1859_v30 = vld [vmem:[%s2541_s4 + $0x3] ss:$0 sm:$0xff] }
 0x1ae   : > { %v748_v32 = vmul.f32 0.25, %v686_v31 }
 0x22b   : > { %v605_v54 = vpop.f32.mrf.mxu3 }
 0x22c   : > { %v606_v55 = vadd.f32 %v605_v54, %v2162_v53 }
 0x22e   : > { %v609_v56 = vsel %vm608_vm7, %v606_v55, -inf }
 0x22f   : > { %610 = vmax.xlane.f32.xlu1 %v609_v56 }
 0x2a2   : > { %v611_v1 = vpop.xlane.xlu1 %610 }
 0x2a3   : > { %v612_v2 = vsub.f32 %v606_v55, %v611_v1  ;;  %v1857_v1 = vld [vmem:[%s2545_s8] ss:$0 sm:$0xff] }
 0x2a5   : > { %v613_v3 = vmul.f32 1.442695, %v612_v2 }
 0x2a7   : > { %1881 = vpow2.f32 %v613_v3 }
 0x2ad   : > { %v1882_v4 = vpop.eup %1881 }
 0x2ae   : > { %v615_v5 = vsel %vm608_vm7, %v1882_v4, 0.0 }
 0x2af   : > { %616 = vadd.xlane.f32.xlu1 %v615_v5 }
 0x322   : > { %v617_v16 = vpop.xlane.xlu1 %616 }
 0x323   : > { %1883 = vrcp.f32 %v617_v16  ;;  %v629_v22 = vand.u32 2147483648, %v617_v16  ;;  %v627_v24 = vand.u32 2147483647, %v617_v16  ;;  %vm623_vm9 = vweird.f32 %v617_v16 }
 0x325   : > { %v630_v26 = vor.u32 1.1754944e-38, %v629_v22  ;;  %vm628_vm11 = vcmp.eq.f32.partialorder %v627_v24, 8.507059e+37 }
 0x329   : > { %v1884_v19 = vpop.eup %1883 }
 0x32a   : > { %v619_v20 = vmul.f32 %v1884_v19, %v617_v16  ;;  %vm624_vm8 = vweird.f32 %v1884_v19  ;;  %v907_v16 = vld [vmem:[%s2546_s9] sm:$0xff] }
 0x32b   : > { %vm625_vm10 = vmor %vm623_vm9, %vm624_vm8 }
 0x32c   : > { %v620_v21 = vsub.f32 1.0, %v619_v20 }
 0x32e   : > { %v621_v23 = vmul.f32 %v1884_v19, %v620_v21 }
 0x330   : > { %v622_v25 = vadd.f32 %v1884_v19, %v621_v23 }
 0x332   : > { %v626_v27 = vsel %vm625_vm10, %v1884_v19, %v622_v25 }
 0x333   : > { %v631_v28 = vsel %vm628_vm11, %v630_v26, %v626_v27 }
 0x334   : > { %v632_v0 = vmul.f32 %v1882_v4, %v631_v28  ;;  %v1858_v28 = vld [vmem:[%s2541_s4 + $0x2] ss:$0 sm:$0xff] }
 0x336   : > { %1701 = vmatmul.msk.f32.vlgmr.msrb.gmra.mxu3 %vm608_vm7, %v632_v0 }
 0x337   : > { %930 = vmatpush.msrb.mxu3 %v910_v14 }
 0x33e   : > { %1721 = vmatmul.msk.f32.vlgmr.msra.gmra.mxu3 %vm581_vm5, %v748_v32 }
 0x3b9   : > { %v653_v37 = vpop.f32.mrf.mxu3 }
 0x3ba   : > { %1726 = vmatmul.msk.f32.vlgmr.msra.gmra.mxu2 %vm581_vm5, %v653_v37  ;;  %v1860_v37 = vld [vmem:[%s2547_s10] ss:$0 sm:$0xff] }
 0x3c1   : > { %v772_v38 = vpop.f32.mrf.mxu3 }
 0x3c2   : > { %v773_v39 = vadd.f32 %v772_v38, %v2162_v53 }
 0x3c4   : > { %v775_v41 = vsel %vm608_vm7, %v773_v39, -inf }
 0x3c5   : > { %776 = vmax.xlane.f32.xlu2 %v775_v41 }
 0x438   : > { %v777_v42 = vpop.xlane.xlu2 %776 }
 0x439   : > { %v778_v43 = vsub.f32 %v773_v39, %v777_v42  ;;  %v1747_v42 = vld [vmem:[%s2542_s5 + $0x118] sm:$0xff] }
 0x43a   : > { %1075 = vmatpush.msrb.mxu2 %v1747_v42 }
 0x43b   : > { %v779_v44 = vmul.f32 1.442695, %v778_v43  ;;  %v1753_v43 = vld [vmem:[%s2542_s5 + $0x158] sm:$0xff] }
 0x43d   : > { %1885 = vpow2.f32 %v779_v44  ;;  %v868_v2 = vpop.f32.mrf.mxu2  ;;  %v1746_v44 = vld [vmem:[%s2542_s5 + $0x110] sm:$0xff] }
 0x43e   : > { %1076 = vmatpush.msrb.mxu2 %v1746_v44 }
 0x443   : > { %v1886_v45 = vpop.eup %1885 }
 0x444   : > { %v781_v46 = vsel %vm608_vm7, %v1886_v45, 0.0 }
 0x445   : > { %782 = vadd.xlane.f32.xlu2 %v781_v46  ;;  %v1745_v46 = vld [vmem:[%s2542_s5 + $0x108] sm:$0xff] }
 0x446   : > { %1077 = vmatpush.msrb.mxu2 %v1745_v46 }
 0x448   : > { %1078 = vmatpush.msrb.mxu2 %v1744_v48  ;;  %v1869_v48 = vld [vmem:[%s2543_s6 + $0xb] ss:$0 sm:$0xff] }
 0x45d   : > { %975 = vperm.xlu2 %1847, %v434_v35  }
 0x4b8   : > { %v783_v49 = vpop.xlane.xlu2 %782 }
 0x4b9   : > { %1887 = vrcp.f32 %v783_v49  ;;  %v795_v55 = vand.u32 2147483648, %v783_v49  ;;  %v793_v57 = vand.u32 2147483647, %v783_v49  ;;  %vm789_vm13 = vweird.f32 %v783_v49 }
 0x4bb   : > { %v796_v59 = vor.u32 1.1754944e-38, %v795_v55  ;;  %vm794_vm15 = vcmp.eq.f32.partialorder %v793_v57, 8.507059e+37  ;;  %v1767_v55 = vld [vmem:[%s2542_s5 + $0x120] sm:$0xff] }
 0x4bf   : > { %v1888_v50 = vpop.eup %1887 }
 0x4c0   : > { %v785_v52 = vmul.f32 %v1888_v50, %v783_v49  ;;  %vm790_vm12 = vweird.f32 %v1888_v50  ;;  %v1750_v49 = vld [vmem:[%s2542_s5 + $0x140] sm:$0xff] }
 0x4c1   : > { %vm791_vm14 = vmor %vm789_vm13, %vm790_vm12 }
 0x4c2   : > { %v786_v54 = vsub.f32 1.0, %v785_v52  ;;  %v1769_v52 = vld [vmem:[%s2542_s5 + $0x130] sm:$0xff] }
 0x4c4   : > { %v787_v56 = vmul.f32 %v1888_v50, %v786_v54  ;;  %v1768_v54 = vld [vmem:[%s2542_s5 + $0x128] sm:$0xff] }
 0x4c6   : > { %v788_v58 = vadd.f32 %v1888_v50, %v787_v56  ;;  %v1861_v56 = vld [vmem:[%s2547_s10 + $0x1] ss:$0 sm:$0xff] }
 0x4c8   : > { %v792_v60 = vsel %vm791_vm14, %v1888_v50, %v788_v58  ;;  %v1770_v50 = vld [vmem:[%s2542_s5 + $0x138] sm:$0xff] }
 0x4c9   : > { %v797_v61 = vsel %vm794_vm15, %v796_v59, %v792_v60  ;;  %v2325_v59 = vpop.permute.xlu2 %975 }
 0x4ca   : > { %v798_v62 = vmul.f32 %v1886_v45, %v797_v61  ;;  %v1752_v45 = vld [vmem:[%s2542_s5 + $0x150] sm:$0xff] }
 0x4cc   : > { %1722 = vmatmul.msk.f32.vlgmr.msra.gmra.mxu0 %vm608_vm7, %v798_v62 }
 0x549   : > { %v819_v63 = vpop.f32.mrf.mxu0 }
 0x54a   : > { %1725 = vmatmul.msk.f32.vlgmr.msra.gmra.mxu1 %vm581_vm5, %v819_v63  ;;  %v1741_v63 = vld [vmem:[%s2542_s5 + $0xd8] sm:$0xff] }
 0x54b   : > { %1042 = vmatpush.msrb.mxu1 %v1741_v63 }
 0x5c7   : > { %v845_v3 = vpop.f32.mrf.mxu1 }
 0x5c8   : > { %v869_v4 = vadd.f32 %v868_v2, %v845_v3  ;;  %v1739_v2 = vld [vmem:[%s2542_s5 + $0xc8] sm:$0xff]  ;;  %v1738_v3 = vld [vmem:[%s2542_s5 + $0xc0] sm:$0xff] }
 0x5ca   : > { %v875_v5 = vadd.f32 %v1857_v1, %v869_v4  ;;  %v1740_v1 = vld [vmem:[%s2542_s5 + $0xd0] sm:$0xff] }
 0x5cb   : > { %1043 = vmatpush.msrb.mxu1 %v1740_v1 }
 0x5cc   : > { %v876_v6 = vadd.f32 %v875_v5, %v2142_v40  ;;  %v909_v40 = vld [vmem:[%s2546_s9 + $0x10] sm:$0xff] }
 0x5cd   : > { %931 = vmatpush.msrb.mxu3 %v909_v40  ;;  %1044 = vmatpush.msrb.mxu1 %v1739_v2 }
 0x5ce   : > { %v877_v7 = vsel %vm448_vm0, %v876_v6, 0.0 }
 0x5cf   : > { %878 = vadd.xlane.f32.xlu0 %v877_v7  ;;  %932 = vmatpush.msrb.mxu3 %v908_v15  ;;  %v1764_v15 = vld [vmem:[%s2542_s5 + $0xf8] sm:$0xff] }
 0x5d0   : > { %1045 = vmatpush.msrb.mxu1 %v1738_v3  ;;  %1212 = vmatpush.msra.mxu2 %v1764_v15 }
 0x5d1   : > { %933 = vmatpush.msrb.mxu3 %v907_v16  ;;  %v1763_v16 = vld [vmem:[%s2542_s5 + $0xf0] sm:$0xff] }
 0x5d2   : > { %1213 = vmatpush.msra.mxu2 %v1763_v16 }
 0x5d3   : > { %1105 = vmatpush.msra.mxu3 %v1753_v43 }
 0x5d4   : > { %1214 = vmatpush.msra.mxu2 %v1762_v17 }
 0x5d5   : > { %1106 = vmatpush.msra.mxu3 %v1752_v45 }
 0x5d6   : > { %1215 = vmatpush.msra.mxu2 %v1761_v18 }
 0x5d7   : > { %1107 = vmatpush.msra.mxu3 %v1751_v47 }
 0x5d9   : > { %1108 = vmatpush.msra.mxu3 %v1750_v49 }
 0x642   : > { %v879_v9 = vpop.xlane.xlu0 %878 }
 0x643   : > { %v880_v10 = vmul.f32 %v879_v9, %v2092_v8 }
 0x645   : > { %v881_v11 = vsub.f32 %v876_v6, %v880_v10  ;;  %v1862_v10 = vld [vmem:[%s2543_s6 + $0x8] ss:$0 sm:$0xff] }
 0x647   : > { %v882_v12 = vmul.f32 %v881_v11, %v881_v11 }
 0x649   : > { %v883_v13 = vsel %vm448_vm0, %v882_v12, 0.0 }
 0x64a   : > { %884 = vadd.xlane.f32.xlu1 %v883_v13 }
 0x6bd   : > { %v885_v19 = vpop.xlane.xlu1 %884 }
 0x6be   : > { %v886_v20 = vmul.f32 %v885_v19, %v2092_v8 }
 0x6c0   : > { %v887_v21 = vadd.f32 1e-08, %v886_v20 }
 0x6c2   : > { %1889 = vrsqrt.f32 %v887_v21  ;;  %vm894_vm2 = vweird.f32 %v887_v21 }
 0x6c8   : > { %v1890_v22 = vpop.eup %1889 }
 0x6c9   : > { %v889_v23 = vmul.f32 %v1890_v22, %v887_v21  ;;  %vm895_vm1 = vweird.f32 %v1890_v22 }
 0x6ca   : > { %vm896_vm3 = vmor %vm894_vm2, %vm895_vm1 }
 0x6cb   : > { %v890_v24 = vmul.f32 %v1890_v22, %v889_v23 }
 0x6cd   : > { %v891_v25 = vmul.f32 0.5, %v890_v24 }
 0x6cf   : > { %v892_v26 = vsub.f32 1.5, %v891_v25 }
 0x6d1   : > { %v893_v27 = vmul.f32 %v1890_v22, %v892_v26 }
 0x6d3   : > { %v897_v29 = vsel %vm896_vm3, %v1890_v22, %v893_v27 }
 0x6d4   : > { %v898_v0 = vmul.f32 %v897_v29, %v881_v11  ;;  %v1863_v11 = vld [vmem:[%s2543_s6 + $0xa] ss:$0 sm:$0xff] }
 0x6d6   : > { %v902_v31 = vmul.f32 %v1858_v28, %v898_v0  ;;  %v1865_v28 = vld [vmem:[%s2541_s4 + $0x4] ss:$0 sm:$0xff] }
 0x6d8   : > { %v906_v32 = vadd.f32 %v1859_v30, %v902_v31  ;;  %v1866_v30 = vld [vmem:[%s2541_s4 + $0x5] ss:$0 sm:$0xff]  ;;  %v1864_v31 = vld [vmem:[%s2543_s6 + $0x9] ss:$0 sm:$0xff] }
 0x6da   : > { %1727 = vmatmul.msk.f32.vlgmr.msrb.gmra.mxu3 %vm448_vm0, %v906_v32 }
 0x6db   : > { %1242 = vmatpush.msrb.mxu3 %v1770_v50 }
 0x6dd   : > { %1243 = vmatpush.msrb.mxu3 %v1769_v52 }
 0x6df   : > { %1244 = vmatpush.msrb.mxu3 %v1768_v54 }
 0x6e1   : > { %1245 = vmatpush.msrb.mxu3 %v1767_v55 }
 0x75d   : > { %v935_v38 = vpop.f32.mrf.mxu3 }
 0x75e   : > { %v936_v39 = vadd.f32 %v1860_v37, %v935_v38  ;;  %v1775_v37 = vld [vmem:[%s2542_s5 + $0x170] sm:$0xff]  ;;  %v1774_v38 = vld [vmem:[%s2542_s5 + $0x168] sm:$0xff] }
 0x760   : > { %v938_v41 = vmax.f32 %v936_v39, 0.0  ;;  %v1773_v39 = vld [vmem:[%s2542_s5 + $0x160] sm:$0xff] }
 0x762   : > { %1733 = vmatmul.msk.f32.vlgmr.msrb.gmra.mxu0 %vm448_vm0, %v938_v41  ;;  %v1867_v41 = vld [vmem:[%s2543_s6 + $0x6] ss:$0 sm:$0xff] }
 0x7df   : > { %v969_v57 = vpop.f32.mrf.mxu0 }
 0x7e0   : > { %v970_v58 = vadd.f32 %v1861_v56, %v969_v57 }
 0x7e2   : > { %v972_v60 = vadd.f32 %v970_v58, %v906_v32  ;;  %v1760_v58 = vld [vmem:[%s2544_s7 + $0x28] sm:$0xff] }
 0x7e4   : > { %v2328_v61 = vmul.f32 %v2325_v59, %v972_v60 }
 0x7e6   : > { %1749 = vmatmul.msk.f32.vlgmr.msrb.gmra.mxu2 %vm448_vm0, %v2328_v61  ;;  %1755 = vmatmul.msk.f32.vlgmr.msra.gmra.mxu3 %vm448_vm0, %v2328_v61  ;;  %v987_v62 = vsel %vm448_vm0, %v2328_v61, 0.0 }
 0x7e7   : > { %988 = vadd.xlane.f32.xlu0 %v987_v62 }
 0x7ee   : > { %1772 = vmatmul.msk.f32.vlgmr.msrb.gmra.mxu3 %vm448_vm0, %v2328_v61 }
 0x85a   : > { %v989_v4 = vpop.xlane.xlu0 %988 }
 0x85b   : > { %v990_v5 = vmul.f32 %v989_v4, %v2092_v8 }
 0x85d   : > { %v991_v6 = vsub.f32 %v2328_v61, %v990_v5 }
 0x85f   : > { %v992_v7 = vmul.f32 %v991_v6, %v991_v6 }
 0x861   : > { %v993_v9 = vsel %vm448_vm0, %v992_v7, 0.0 }
 0x862   : > { %994 = vadd.xlane.f32.xlu1 %v993_v9  ;;  %v1868_v9 = vld [vmem:[%s2543_s6 + $0x7] ss:$0 sm:$0xff] }
 0x869   : > { %v1080_v12 = vpop.f32.mrf.mxu2  ;;  %v1110_v13 = vpop.f32.mrf.mxu3 }
 0x86a   : > { %v1081_v14 = vadd.f32 %v1862_v10, %v1080_v12  ;;  %v1111_v40 = vadd.f32 %v1863_v11, %v1110_v13 }
 0x86c   : > { %1756 = vmatpush.xpose.msk.msra.mxu0 %vm581_vm5, %v1081_v14  ;;  %1182 = vmatpush.msra.mxu1 %v1111_v40  ;;  %v1759_v14 = vld [vmem:[%s2544_s7 + $0x20] sm:$0xff] }
 0x870   : > { %1272 = vmatpush.msrb.mxu0 %v1776_v36 }
 0x871   : > { %v1247_v32 = vpop.f32.mrf.mxu3 }
 0x872   : > { %v1248_v35 = vadd.f32 %v1864_v31, %v1247_v32  ;;  %1273 = vmatpush.msrb.mxu0 %v1775_v37  ;;  %v1870_v37 = vld [vmem:[%s2545_s8 + $0x1] ss:$0 sm:$0xff] }
 0x874   : > { %1274 = vmatpush.msrb.mxu0 %v1774_v38 }
 0x876   : > { %1275 = vmatpush.msrb.mxu0 %v1773_v39 }
 0x8d5   : > { %v995_v19 = vpop.xlane.xlu1 %994 }
 0x8d6   : > { %v996_v20 = vmul.f32 %v995_v19, %v2092_v8 }
 0x8d8   : > { %v997_v21 = vadd.f32 1e-08, %v996_v20 }
 0x8da   : > { %1891 = vrsqrt.f32 %v997_v21  ;;  %vm1004_vm6 = vweird.f32 %v997_v21 }
 0x8e0   : > { %v1892_v22 = vpop.eup %1891 }
 0x8e1   : > { %v999_v23 = vmul.f32 %v1892_v22, %v997_v21  ;;  %vm1005_vm4 = vweird.f32 %v1892_v22 }
 0x8e2   : > { %vm1006_vm8 = vmor %vm1004_vm6, %vm1005_vm4 }
 0x8e3   : > { %v1000_v24 = vmul.f32 %v1892_v22, %v999_v23  ;;  %v1783_v23 = vld [vmem:[%s2544_s7 + $0x38] sm:$0xff] }
 0x8e4   : > { %1374 = vmatpush.msra.mxu3 %v1783_v23 }
 0x8e5   : > { %v1001_v25 = vmul.f32 0.5, %v1000_v24  ;;  %v1782_v24 = vld [vmem:[%s2544_s7 + $0x30] sm:$0xff] }
 0x8e6   : > { %1375 = vmatpush.msra.mxu3 %v1782_v24 }
 0x8e7   : > { %v1002_v26 = vsub.f32 1.5, %v1001_v25 }
 0x8e9   : > { %v1003_v27 = vmul.f32 %v1892_v22, %v1002_v26 }
 0x8eb   : > { %v1007_v29 = vsel %vm1006_vm8, %v1892_v22, %v1003_v27  ;;  %vm1559_vm8 = vcmask 1040384  }
 0x8ec   : > { %v1008_v0 = vmul.f32 %v1007_v29, %v991_v6 }
 0x8ee   : > { %v1012_v33 = vmul.f32 %v1865_v28, %v1008_v0 }
 0x8f0   : > { %v2382_v34 = vadd.f32 %v1866_v30, %v1012_v33 }
 0x8f2   : > { %1743 = vmatmul.msk.f32.vlgmr.msrb.gmra.mxu1 %vm448_vm0, %v2382_v34  ;;  %1766 = vmatmul.msk.f32.vlgmr.msra.gmra.mxu2 %vm448_vm0, %v2382_v34 }
 0x8f3   : > { %1779 = vmatpush.xpose.msk.msrb.mxu1 %vm581_vm5, %v1248_v35 }
 0x96f   : > { %v1047_v42 = vpop.f32.mrf.mxu1 }
 0x970   : > { %v1048_v43 = vadd.f32 %v1867_v41, %v1047_v42 }
 0x972   : > { %v1113_v44 = vmul.f32 0.25, %v1048_v43 }
 0x974   : > { %1757 = vmatmul.msk.f32.vlgmr.msra.gmra.mxu0 %vm581_vm5, %v1113_v44 }
 0x975   : > { %1397 = vmatpush.msra.mxu0 %v1760_v58  ;;  %v1217_v11 = vpop.f32.mrf.mxu2 }
 0x976   : > { %v1218_v12 = vadd.f32 %v1868_v9, %v1217_v11  ;;  %v1794_v11 = vld [vmem:[%s2546_s9 + $0x68] sm:$0xff] }
 0x977   : > { %1398 = vmatpush.msra.mxu0 %v1759_v14 }
 0x978   : > { %v1280_v13 = vmul.f32 0.25, %v1218_v12  ;;  %v1793_v12 = vld [vmem:[%s2546_s9 + $0x60] sm:$0xff] }
 0x97c   : > { %1778 = vmatmul.msk.f32.vlgmr.msrb.gmra.mxu0 %vm448_vm0, %v2328_v61 }
 0x9f1   : > { %v1137_v45 = vpop.f32.mrf.mxu0 }
 0x9f2   : > { %v1138_v46 = vadd.f32 %v1137_v45, %v2162_v53 }
 0x9f4   : > { %v1140_v47 = vsel %vm608_vm7, %v1138_v46, -inf }
 0x9f5   : > { %1141 = vmax.xlane.f32.xlu0 %v1140_v47 }
 0x9f9   : > { %v1277_v49 = vpop.f32.mrf.mxu0 }
 0x9fa   : > { %v1278_v50 = vadd.f32 %v1869_v48, %v1277_v49 }
 0x9fc   : > { %1349 = vmatpush.msrb.mxu2 %v1278_v50  ;;  %v1790_v50 = vld [vmem:[%s2546_s9 + $0x58] sm:$0xff] }
 0xa68   : > { %v1142_v52 = vpop.xlane.xlu0 %1141 }
 0xa69   : > { %v1143_v54 = vsub.f32 %v1138_v46, %v1142_v52  ;;  %v1788_v52 = vld [vmem:[%s2546_s9 + $0x48] sm:$0xff] }
 0xa6b   : > { %v1144_v55 = vmul.f32 1.442695, %v1143_v54  ;;  %v1787_v54 = vld [vmem:[%s2546_s9 + $0x40] sm:$0xff] }
 0xa6d   : > { %1893 = vpow2.f32 %v1144_v55  ;;  %v1796_v55 = vld [vmem:[%s2546_s9 + $0x78] sm:$0xff] }
 0xa6e   : > { %1499 = vmatpush.msra.mxu2 %v1796_v55 }
 0xa73   : > { %v1894_v56 = vpop.eup %1893 }
 0xa74   : > { %v1146_v57 = vsel %vm608_vm7, %v1894_v56, 0.0 }
 0xa75   : > { %1147 = vadd.xlane.f32.xlu1 %v1146_v57 }
 0xae8   : > { %v1148_v60 = vpop.xlane.xlu1 %1147 }
 0xae9   : > { %1895 = vrcp.f32 %v1148_v60  ;;  %v1160_v1 = vand.u32 2147483648, %v1148_v60  ;;  %v1158_v3 = vand.u32 2147483647, %v1148_v60  ;;  %vm1154_vm10 = vweird.f32 %v1148_v60 }
 0xaeb   : > { %v1161_v5 = vor.u32 1.1754944e-38, %v1160_v1  ;;  %vm1159_vm12 = vcmp.eq.f32.partialorder %v1158_v3, 8.507059e+37 }
 0xaef   : > { %v1896_v61 = vpop.eup %1895 }
 0xaf0   : > { %v1150_v62 = vmul.f32 %v1896_v61, %v1148_v60  ;;  %vm1155_vm9 = vweird.f32 %v1896_v61 }
 0xaf1   : > { %vm1156_vm11 = vmor %vm1154_vm10, %vm1155_vm9 }
 0xaf2   : > { %v1151_v63 = vsub.f32 1.0, %v1150_v62 }
 0xaf4   : > { %v1152_v2 = vmul.f32 %v1896_v61, %v1151_v63 }
 0xaf6   : > { %v1153_v4 = vadd.f32 %v1896_v61, %v1152_v2 }
 0xaf8   : > { %v1157_v6 = vsel %vm1156_vm11, %v1896_v61, %v1153_v4  ;;  %v1871_v4 = vld [vmem:[%s2541_s4 + $0x6] ss:$0 sm:$0xff] }
 0xaf9   : > { %v1162_v7 = vsel %vm1159_vm12, %v1161_v5, %v1157_v6 }
 0xafa   : > { %v1163_v10 = vmul.f32 %v1894_v56, %v1162_v7  ;;  %v1795_v56 = vld [vmem:[%s2546_s9 + $0x70] sm:$0xff]  ;;  %v1872_v7 = vld [vmem:[%s2541_s4 + $0x7] ss:$0 sm:$0xff] }
 0xafb   : > { %1500 = vmatpush.msra.mxu2 %v1795_v56 }
 0xafc   : > { %1758 = vmatmul.msk.f32.vlgmr.msra.gmra.mxu1 %vm608_vm7, %v1163_v10 }
 0xafd   : > { %1465 = vmatpush.msra.mxu1 %v1790_v50  ;;  %1501 = vmatpush.msra.mxu2 %v1794_v11 }
 0xaff   : > { %1502 = vmatpush.msra.mxu2 %v1793_v12 }
 0xb04   : > { %1780 = vmatmul.msk.f32.vlgmr.msrb.gmra.mxu1 %vm581_vm5, %v1280_v13  ;;  %v1873_v13 = vld [vmem:[%s2547_s10 + $0x2] ss:$0 sm:$0xff] }
 0xb79   : > { %v1184_v40 = vpop.f32.mrf.mxu1 }
 0xb7a   : > { %1785 = vmatmul.msk.f32.vlgmr.msra.gmra.mxu0 %vm581_vm5, %v1184_v40 }
 0xb81   : > { %v1304_v15 = vpop.f32.mrf.mxu1 }
 0xb82   : > { %v1305_v16 = vadd.f32 %v1304_v15, %v2162_v53 }
 0xb84   : > { %v1307_v17 = vsel %vm608_vm7, %v1305_v16, -inf }
 0xb85   : > { %1308 = vmax.xlane.f32.xlu0 %v1307_v17 }
 0xbf7   : > { %v1400_v38 = vpop.f32.mrf.mxu0 }
 0xbf8   : > { %v1309_v18 = vpop.xlane.xlu0 %1308 }
 0xbf9   : > { %v1310_v19 = vsub.f32 %v1305_v16, %v1309_v18  ;;  %v1874_v16 = vld [vmem:[%s2547_s10 + $0x3] ss:$0 sm:$0xff] }
 0xbfb   : > { %v1311_v20 = vmul.f32 1.442695, %v1310_v19 }
 0xbfd   : > { %1897 = vpow2.f32 %v1311_v20 }
 0xc03   : > { %v1898_v21 = vpop.eup %1897 }
 0xc04   : > { %v1313_v22 = vsel %vm608_vm7, %v1898_v21, 0.0 }
 0xc05   : > { %1314 = vadd.xlane.f32.xlu1 %v1313_v22 }
 0xc78   : > { %v1315_v53 = vpop.xlane.xlu1 %1314 }
 0xc79   : > { %1899 = vrcp.f32 %v1315_v53  ;;  %v1327_v28 = vand.u32 2147483648, %v1315_v53  ;;  %v1325_v0 = vand.u32 2147483647, %v1315_v53  ;;  %vm1321_vm14 = vweird.f32 %v1315_v53 }
 0xc7b   : > { %v1328_v31 = vor.u32 1.1754944e-38, %v1327_v28  ;;  %vm1326_vm1 = vcmp.eq.f32.partialorder %v1325_v0, 8.507059e+37 }
 0xc7f   : > { %v1900_v25 = vpop.eup %1899 }
 0xc80   : > { %v1317_v26 = vmul.f32 %v1900_v25, %v1315_v53  ;;  %vm1322_vm13 = vweird.f32 %v1900_v25 }
 0xc81   : > { %vm1323_vm15 = vmor %vm1321_vm14, %vm1322_vm13 }
 0xc82   : > { %v1318_v27 = vsub.f32 1.0, %v1317_v26 }
 0xc84   : > { %v1319_v29 = vmul.f32 %v1900_v25, %v1318_v27 }
 0xc86   : > { %v1320_v30 = vadd.f32 %v1900_v25, %v1319_v29 }
 0xc88   : > { %v1324_v32 = vsel %vm1323_vm15, %v1900_v25, %v1320_v30 }
 0xc89   : > { %v1329_v33 = vsel %vm1326_vm1, %v1328_v31, %v1324_v32 }
 0xc8a   : > { %v1330_v35 = vmul.f32 %v1898_v21, %v1329_v33  ;;  %v1875_v33 = vld [vmem:[%s2541_s4 + $0x8] ss:$0 sm:$0xff] }
 0xc8c   : > { %1781 = vmatmul.msk.f32.vlgmr.msrb.gmra.mxu2 %vm608_vm7, %v1330_v35 }
 0xd0f   : > { %v1351_v36 = vpop.f32.mrf.mxu2 }
 0xd10   : > { %1784 = vmatmul.msk.f32.vlgmr.msra.gmra.mxu3 %vm581_vm5, %v1351_v36  ;;  %v1876_v36 = vld [vmem:[%s2541_s4 + $0x9] ss:$0 sm:$0xff] }
 0xd93   : > { %v1377_v39 = vpop.f32.mrf.mxu3 }
 0xd94   : > { %v1401_v41 = vadd.f32 %v1400_v38, %v1377_v39  ;;  %v1548_v38 = vld [vmem:[%s432_s24] sm:$0xff]  ;;  %s1578_s24 = sshll.u32 %s1574_s29, 4  ;;  %s1579_s24 = int_to_ptr.hbm [resolvable:$true] %s1578_s24 }
 0xd95   : > { %v1543_v39 = vld [vmem:[%s428_s13] sm:$0xff]  ;;  %s1919_s12 = sshra.s32 %s1579_s24, 4  ;;  %s1920_s12 = int_to_ptr.hbm [resolvable:$true] %s1919_s12 }
 0xd96   : > { %v1408_v42 = vadd.f32 %v1870_v37, %v1401_v41  ;;  %s1921_s13 = scalar_lea.hbm %s1920_s12, 2  ;;  %p1926_p0 = scmp.lt.s32.totalorder %s1920_s12, %s2548_s11 }
 0xd97   : > { %p1922_p11 = scmp.ne.s32.totalorder %s1920_s12, %s1921_s13  ;;  %p1927_p1 = scmp.lt.s32.totalorder %s1925_s22, %s1921_s13 }
 0xd98   : > { %v1409_v43 = vadd.f32 %v1408_v42, %v2382_v34  ;;  %v1789_v34 = vld [vmem:[%s2546_s9 + $0x50] sm:$0xff] }
 0xd99   : > { %1466 = vmatpush.msra.mxu1 %v1789_v34  ;;  %p1923_p12 = pnand %p1922_p11, %p2070_p5  ;;  %p1928_p2 = por %p1927_p1, %p1926_p0 }
 0xd9a   : > { %v1410_v44 = vsel %vm448_vm0, %v1409_v43, 0.0 }
 0xd9b   : > { %1411 = vadd.xlane.f32.xlu2 %v1410_v44  ;;  %1467 = vmatpush.msra.mxu1 %v1788_v52  ;;  %p1924_p13 = pneg %p1923_p12 }
 0xd9d   : > { %1468 = vmatpush.msra.mxu1 %v1787_v54  ;;  %p1929_p3 = pnand %p1928_p2, %p1924_p13 }
 0xe0e   : > { %v1412_v45 = vpop.xlane.xlu2 %1411 }
 0xe0f   : > { %v1413_v46 = vmul.f32 %v1412_v45, %v2092_v8 }
 0xe11   : > { %v1414_v47 = vsub.f32 %v1409_v43, %v1413_v46 }
 0xe13   : > { %v1415_v48 = vmul.f32 %v1414_v47, %v1414_v47 }
 0xe15   : > { %v1416_v49 = vsel %vm448_vm0, %v1415_v48, 0.0 }
 0xe16   : > { %1417 = vadd.xlane.f32.xlu0 %v1416_v49 }
 0xe89   : > { %v1418_v57 = vpop.xlane.xlu0 %1417 }
 0xe8a   : > { %v1419_v58 = vmul.f32 %v1418_v57, %v2092_v8 }
 0xe8c   : > { %v1420_v60 = vadd.f32 1e-08, %v1419_v58 }
 0xe8e   : > { %1901 = vrsqrt.f32 %v1420_v60  ;;  %vm1427_vm7 = vweird.f32 %v1420_v60 }
 0xe94   : > { %v1902_v61 = vpop.eup %1901 }
 0xe95   : > { %v1422_v62 = vmul.f32 %v1902_v61, %v1420_v60  ;;  %vm1428_vm5 = vweird.f32 %v1902_v61 }
 0xe96   : > { %vm1429_vm2 = vmor %vm1427_vm7, %vm1428_vm5 }
 0xe97   : > { %v1423_v63 = vmul.f32 %v1902_v61, %v1422_v62 }
 0xe99   : > { %v1424_v1 = vmul.f32 0.5, %v1423_v63 }
 0xe9b   : > { %v1425_v2 = vsub.f32 1.5, %v1424_v1 }
 0xe9d   : > { %v1426_v3 = vmul.f32 %v1902_v61, %v1425_v2 }
 0xe9f   : > { %v1430_v5 = vsel %vm1429_vm2, %v1902_v61, %v1426_v3 }
 0xea0   : > { %v1431_v6 = vmul.f32 %v1430_v5, %v1414_v47 }
 0xea2   : > { %v1435_v9 = vmul.f32 %v1871_v4, %v1431_v6 }
 0xea4   : > { %v1439_v10 = vadd.f32 %v1872_v7, %v1435_v9 }
 0xea6   : > { %1792 = vmatmul.msk.f32.vlgmr.msra.gmra.mxu1 %vm448_vm0, %v1439_v10 }
 0xf23   : > { %v1470_v14 = vpop.f32.mrf.mxu1 }
 0xf24   : > { %v1471_v40 = vadd.f32 %v1873_v13, %v1470_v14 }
 0xf26   : > { %v1473_v15 = vmax.f32 %v1471_v40, 0.0 }
 0xf28   : > { %1798 = vmatmul.msk.f32.vlgmr.msra.gmra.mxu2 %vm448_vm0, %v1473_v15 }
 0xfab   : > { %v1504_v17 = vpop.f32.mrf.mxu2 }
 0xfac   : > { %v1505_v18 = vadd.f32 %v1874_v16, %v1504_v17 }
 0xfae   : > { %v1507_v19 = vadd.f32 %v1505_v18, %v1439_v10 }
 0xfb0   : > { %v1508_v20 = vmul.f32 %v1507_v19, %v2325_v59 }
 0xfb2   : > { %v1513_v21 = vsel %vm448_vm0, %v1508_v20, 0.0 }
 0xfb3   : > { %1514 = vadd.xlane.f32.xlu1 %v1513_v21 }
0x1026   : > { %v1515_v22 = vpop.xlane.xlu1 %1514 }
0x1027   : > { %v1516_v23 = vmul.f32 %v1515_v22, %v2092_v8 }
0x1029   : > { %v1517_v24 = vsub.f32 %v1508_v20, %v1516_v23 }
0x102b   : > { %v1518_v53 = vmul.f32 %v1517_v24, %v1517_v24 }
0x102d   : > { %v1519_v25 = vsel %vm448_vm0, %v1518_v53, 0.0 }
0x102e   : > { %1520 = vadd.xlane.f32.xlu0 %v1519_v25 }
0x10a1   : > { %v1521_v26 = vpop.xlane.xlu0 %1520 }
0x10a2   : > { %v1522_v27 = vmul.f32 %v1521_v26, %v2092_v8 }
0x10a4   : > { %v1523_v28 = vadd.f32 1e-08, %v1522_v27 }
0x10a6   : > { %1903 = vrsqrt.f32 %v1523_v28  ;;  %vm1530_vm4 = vweird.f32 %v1523_v28 }
0x10ac   : > { %v1904_v29 = vpop.eup %1903 }
0x10ad   : > { %v1525_v59 = vmul.f32 %v1904_v29, %v1523_v28  ;;  %vm1531_vm3 = vweird.f32 %v1904_v29 }
0x10ae   : > { %vm1532_vm6 = vmor %vm1530_vm4, %vm1531_vm3 }
0x10af   : > { %v1526_v0 = vmul.f32 %v1904_v29, %v1525_v59 }
0x10b1   : > { %v1527_v30 = vmul.f32 0.5, %v1526_v0 }
0x10b3   : > { %v1528_v31 = vsub.f32 1.5, %v1527_v30 }
0x10b5   : > { %v1529_v32 = vmul.f32 %v1904_v29, %v1528_v31 }
0x10b7   : > { %v1533_v35 = vsel %vm1532_vm6, %v1904_v29, %v1529_v32 }
0x10b8   : > { %v1534_v8 = vmul.f32 %v1533_v35, %v1517_v24 }
0x10ba   : > { %v1538_v37 = vmul.f32 %v1875_v33, %v1534_v8 }
0x10bc   : > { %v1542_v41 = vadd.f32 %v1876_v36, %v1538_v37 }
0x10be   : > { %v1549_v42 = vmul.f32 %v1548_v38, %v1542_v41  ;;  %v1544_v43 = vmul.f32 %v1543_v39, %v1542_v41 }
0x10c0   : > { %v1550_v44 = vsel %vm448_vm0, %v1549_v42, 0.0  ;;  %v1545_v45 = vsel %vm448_vm0, %v1544_v43, 0.0  ;;  %vm1561_vm0 = vcmask 58368  }
0x10c1   : > { %1551 = vadd.xlane.f32.xlu0 %v1550_v44  ;;  %1546 = vadd.xlane.f32.xlu1 %v1545_v45 }
0x1134   : > { %v1552_v46 = vpop.xlane.xlu0 %1551  ;;  %v1547_v47 = vpop.xlane.xlu1 %1546 }
0x1135   : > { %v1557_v48 = vperm.slane %v1552_v46, %v2159_v51  ;;  %v1554_v49 = vperm.slane %v1547_v47, %v2159_v51 }
0x1137   : > { %v1560_v50 = vsel %vm1559_vm8, %v1554_v49, %v1557_v48 }
0x1138   : > { %1562 = vst.msk [vmem:[%s416_s30] sm:$0x3] %vm1561_vm0, %v1560_v50 }
0x1139   : > { %1932 = shalt.err (!%p1929_p3)
}
0x113a   : > { %1805 = dma.vmem_to_hbm [thread:$0]  (%p2070_p5), %s1577_s0, 32, %s1579_s24, %s1564_s21  }
0x113b PF: > { %p1811_p4 = scmp.ge.s32.totalorder %s1967_s20, 2  ;;  %s1590_s14 = sand.u32 1, %s1955_s17  }
0x113c   : > { %s1591_s30 = scalar_lea.sflag [#allocation3], %s1590_s14 }
0x113d   : > { %p1808_p7 = pnand %p1811_p4, %p2074_p6 }
0x113f   : > { %p1809_p8 = pneg %p1808_p7 }
0x1141   : > { %1950 = dma.done.wait (%p1809_p8), %s1591_s30, 32  }
0x1142   : > { %1952 = vsyncadd (%p1809_p8), %s1591_s30, 4294967264  ;;  %p21_p9 = scmp.ge.s32.totalorder %s2057_s23, 4   ;;  %s2553_s17 = smov %s1959_s18 }
0x1143   : > { %s2554_s18 = smov %s1963_s19  ;;  %s2555_s19 = smov %s2068_s26 }
0x1144   : > { %s2556_s20 = smov %s2057_s23  ;;  %23 = sbr.rel (!%p21_p9) target bundleno = 5 (0x5), region = 149 }
0x1149   :  { %1597 = vsyncpa [#allocation3], 1 }
0x114a   :  { %1599 = vsyncpa [#allocation3 + $0x1], 1 }

</bundles_post_ra>
